<compile_context>
chip_gen: v5e
topology: v5e:2x2
jax: 0.10.0
libtpu: 0.0.40
codegen_flags: <defaults>
</compile_context>

<pallas_src>
import functools

import jax
import jax.numpy as jnp
import numpy as np
from jax import lax
from jax.experimental import pallas as pl
from jax.experimental.pallas import tpu as pltpu


def _lstm_attn_kernel(x_ref, w_ref, ctx_ref, out_ref, *,
                      seq_len, batch_pad, hidden, kpad):
    S, Bp, H = seq_len, batch_pad, hidden
    H2, H4, H6, H8 = 2 * H, 4 * H, 6 * H, 8 * H

    # Static, (16,128)-tile-aligned views of the fused weight operand (bf16).
    w_ih = w_ref[pl.ds(0, kpad), :]           # (kpad, 8H): input proj + folded bias row
    w_hh = w_ref[pl.ds(kpad, H2), :]          # (2H,   8H): block-diagonal hidden proj

    # Input projection for BOTH directions and ALL time steps: one MXU matmul.
    # x rows are (t, b)-ordered; forward gate columns see x[t], backward columns x[S-1-t];
    # the all-ones column folds the biases in.
    gx = jnp.dot(x_ref[...], w_ih, preferred_element_type=jnp.float32)   # (S*Bp, 8H) f32
    gx3 = gx.reshape(S, Bp, H8)               # leading-dim split only (no relayout)

    # Loop-invariant lane masks (hoisted).
    lane8 = lax.broadcasted_iota(jnp.int32, (Bp, H8), 1)
    g_mask = (lane8 >= H4) & (lane8 < H6)     # tanh ("g") gate lanes; sigmoid elsewhere
    lane2 = lax.broadcasted_iota(jnp.int32, (Bp, H2), 1)
    fwd_mask = lane2 < H                      # forward half of the packed state [h_f | h_b]

    # Packed state layout: h = [h_fwd | h_bwd] (Bp, 2H); gate columns grouped per gate
    # [i_f,i_b | f_f,f_b | g_f,g_b | o_f,o_b], each block 2H wide, matching the packed state.
    h_bf = jnp.zeros((Bp, H2), jnp.bfloat16)
    c = jnp.zeros((Bp, H2), jnp.float32)
    h_steps = []

    # Fused bidirectional recurrence, fully unrolled: step t = fwd time t and bwd time S-1-t,
    # one (Bp,2H)x(2H,8H) hidden matmul per step.
    for t in range(S):
        z = gx3[t] + jnp.dot(h_bf, w_hh, preferred_element_type=jnp.float32)   # (Bp, 8H)
        # Single EUP pass per step: sigmoid(x) = 0.5*tanh(x/2) + 0.5.
        zt = jnp.tanh(jnp.where(g_mask, z, 0.5 * z))
        act = jnp.where(g_mask, zt, 0.5 * zt + 0.5)
        i_g = act[:, 0:H2]
        f_g = act[:, H2:H4]
        g_g = act[:, H4:H6]
        o_g = act[:, H6:H8]
        c = f_g * c + i_g * g_g
        h = o_g * jnp.tanh(c)
        h_steps.append(h)                      # f32 copy kept for outputs / attention
        h_bf = h.astype(jnp.bfloat16)          # bf16 feedback into the MXU

    # comb[s] = [h_fwd(s) | h_bwd(s)] in input-time order (bwd half comes from step S-1-s).
    comb = [jnp.where(fwd_mask, h_steps[s], h_steps[S - 1 - s]) for s in range(S)]

    # ---- RecAttention: scores -> softmax over seq -> weighted sum, all on (Bp, .) tiles ----
    ctx = ctx_ref[...]                                                     # (2H, 1) f32
    scores = [jnp.dot(comb[s], ctx, preferred_element_type=jnp.float32)    # (Bp, 1) each
              for s in range(S)]
    m = scores[0]
    for s in range(1, S):
        m = jnp.maximum(m, scores[s])
    es = [jnp.exp(scores[s] - m) for s in range(S)]
    l = es[0]
    for s in range(1, S):
        l = l + es[s]
    inv_l = 1.0 / l
    alphas = [es[s] * inv_l for s in range(S)]                             # (Bp, 1) each
    rep = alphas[0] * comb[0]
    for s in range(1, S):
        rep = rep + alphas[s] * comb[s]                                    # (Bp, 2H)

    # ---- single packed output -> one writeback DMA ----
    # rows [0, S)        : per-step hidden states [h_fwd | h_bwd]
    # row  S             : attention-weighted representation
    # rows S+1 / S+2     : h_n / c_n packed [fwd | bwd]
    # rows [S+3, 2S+3)   : alpha[s] lane-broadcast (wrapper reads lane 0)
    for s in range(S):
        out_ref[s] = comb[s]
    out_ref[S] = rep
    out_ref[S + 1] = h_steps[S - 1]            # fwd final (time S-1) | bwd final (time 0)
    out_ref[S + 2] = c
    for s in range(S):
        out_ref[S + 3 + s] = jnp.broadcast_to(alphas[s], (Bp, H2))


def init_params(key, ip_size, hidden):
    ks = jax.random.split(key, 9)
    s = 1.0 / np.sqrt(hidden)

    def u(k, shape, scale):
        return jax.random.uniform(k, shape, jnp.float32, -scale, scale)

    return dict(
        wih_f=u(ks[0], (4 * hidden, ip_size), s),
        whh_f=u(ks[1], (4 * hidden, hidden), s),
        bih_f=u(ks[2], (4 * hidden,), s),
        bhh_f=u(ks[3], (4 * hidden,), s),
        wih_b=u(ks[4], (4 * hidden, ip_size), s),
        whh_b=u(ks[5], (4 * hidden, hidden), s),
        bih_b=u(ks[6], (4 * hidden,), s),
        bhh_b=u(ks[7], (4 * hidden,), s),
        ctx=u(ks[8], (2 * hidden, 1), 0.1),    # bin_context_vector ~ U(-0.1, 0.1)
    )


def recurrent_encoder1_forward(single_hm, params):
    """Returns (hm_rep, bin_alpha, bin_output, (h_n, c_n)), matching the PyTorch module."""
    S, B, I = single_hm.shape
    H = params['whh_f'].shape[1]
    H2, H8 = 2 * H, 8 * H
    Bp = ((B + 7) // 8) * 8                     # pad batch to a full sublane group
    kpad = ((2 * I + 1 + 15) // 16) * 16        # 2I inputs + ones(bias) col, 16-aligned (bf16)

    # ---- parameter glue: fused gate-column layout [i_f,i_b,f_f,f_b,g_f,g_b,o_f,o_b] ----
    def fused_cols(w_t, d):
        rows = w_t.shape[0]
        w4 = w_t.reshape(rows, 4, H)            # PyTorch gate-major columns [i|f|g|o]
        z = jnp.zeros((rows, 4, 2, H), w_t.dtype)
        z = z.at[:, :, d, :].set(w4)
        return z.reshape(rows, H8)

    wih_aug = jnp.concatenate([fused_cols(params['wih_f'].T, 0),
                               fused_cols(params['wih_b'].T, 1)], axis=0)        # (2I, 8H)
    b_row = (fused_cols((params['bih_f'] + params['bhh_f'])[None, :], 0)
             + fused_cols((params['bih_b'] + params['bhh_b'])[None, :], 1))      # (1, 8H)
    wih_full = jnp.concatenate(
        [wih_aug, b_row, jnp.zeros((kpad - 2 * I - 1, H8), jnp.float32)], axis=0)
    whh_bd = jnp.concatenate([fused_cols(params['whh_f'].T, 0),
                              fused_cols(params['whh_b'].T, 1)], axis=0)         # (2H, 8H)
    w_all = jnp.concatenate([wih_full, whh_bd], axis=0).astype(jnp.bfloat16)     # (kpad+2H, 8H)

    ctx = params['ctx'].astype(jnp.float32)                                      # (2H, 1)

    # Augmented, batch-padded input with ones column (bias) and zero padding to kpad lanes.
    x_aug = jnp.concatenate([single_hm, single_hm[::-1]], axis=-1)               # (S, B, 2I)
    x_aug = jnp.pad(x_aug, ((0, 0), (0, Bp - B), (0, 0)))                        # (S, Bp, 2I)
    ones_col = jnp.ones((S, Bp, 1), jnp.float32)
    zero_col = jnp.zeros((S, Bp, kpad - 2 * I - 1), jnp.float32)
    x_in = jnp.concatenate([x_aug, ones_col, zero_col], axis=-1)
    x_in = x_in.reshape(S * Bp, kpad).astype(jnp.bfloat16)                       # (S*Bp, kpad)

    kernel = functools.partial(_lstm_attn_kernel, seq_len=S, batch_pad=Bp,
                               hidden=H, kpad=kpad)
    vmem = lambda: pl.BlockSpec(memory_space=pltpu.MemorySpace.VMEM)

    # Single invocation, whole working set (<100 KB) resident in VMEM: no grid / tiling.
    packed = pl.pallas_call(
        kernel,
        out_shape=jax.ShapeDtypeStruct((2 * S + 3, Bp, H2), jnp.float32),
        in_specs=[vmem(), vmem(), vmem()],
        out_specs=vmem(),
    )(x_in, w_all, ctx)

    hs = packed[0:S, :B, :]                        # (S, B, 2H)
    rep = packed[S, :B, :]                         # (B, 2H)
    hn = packed[S + 1, :B, :]                      # (B, 2H) packed [fwd | bwd]
    cn = packed[S + 2, :B, :]                      # (B, 2H) packed [fwd | bwd]
    alpha_sb = packed[S + 3:2 * S + 3, :B, 0]      # (S, B)

    bin_output = jnp.transpose(hs, (1, 0, 2))      # (B, S, 2H)
    bin_alpha = alpha_sb.T                         # (B, S)
    hm_rep = rep[:, None, :]                       # (B, 1, 2H)
    h_n = jnp.stack([hn[:, :H], hn[:, H:]], axis=0)    # (2, B, H)
    c_n = jnp.stack([cn[:, :H], cn[:, H:]], axis=0)    # (2, B, H)
    return hm_rep, bin_alpha, bin_output, (h_n, c_n)


def reference_forward(x, p):
    """Pure-JAX f32 reference replicating nn.LSTM(bidirectional) + RecAttention."""
    S, B, I = x.shape
    H = p['whh_f'].shape[1]

    def cell(x_t, h, c, wih, whh, b):
        g = x_t @ wih.T + h @ whh.T + b
        i = jax.nn.sigmoid(g[:, :H])
        f = jax.nn.sigmoid(g[:, H:2 * H])
        gg = jnp.tanh(g[:, 2 * H:3 * H])
        o = jax.nn.sigmoid(g[:, 3 * H:])
        c = f * c + i * gg
        h = o * jnp.tanh(c)
        return h, c

    b_f = p['bih_f'] + p['bhh_f']
    b_b = p['bih_b'] + p['bhh_b']

    h = jnp.zeros((B, H)); c = jnp.zeros((B, H))
    outs_f = []
    for t in range(S):
        h, c = cell(x[t], h, c, p['wih_f'], p['whh_f'], b_f)
        outs_f.append(h)
    hf, cf = h, c

    h = jnp.zeros((B, H)); c = jnp.zeros((B, H))
    outs_b = [None] * S
    for t in range(S - 1, -1, -1):
        h, c = cell(x[t], h, c, p['wih_b'], p['whh_b'], b_b)
        outs_b[t] = h
    hb, cb = h, c

    out = jnp.concatenate([jnp.stack(outs_f), jnp.stack(outs_b)], axis=-1)   # (S,B,2H)
    bin_output = jnp.transpose(out, (1, 0, 2))                               # (B,S,2H)
    scores = jnp.einsum('bsh,hk->bsk', bin_output, p['ctx'])[..., 0]         # (B,S)
    alpha = jax.nn.softmax(scores, axis=1)
    hm_rep = jnp.einsum('bs,bsh->bh', alpha, bin_output)[:, None, :]
    return hm_rep, alpha, bin_output, (jnp.stack([hf, hb]), jnp.stack([cf, cb]))


if __name__ == "__main__":
    SEQ, BATCH, IP, HID = 8, 2, 16, 32   # n_bins=8, ip_bin_size=16, args.bin_rnn_size=32

    key = jax.random.PRNGKey(0)
    kx, kp = jax.random.split(key)
    single_hm = jax.random.normal(kx, (SEQ, BATCH, IP), jnp.float32)
    params = init_params(kp, IP, HID)

    hm_rep, bin_alpha, bin_output, (h_n, c_n) = jax.block_until_ready(
        recurrent_encoder1_forward(single_hm, params))

    ref_rep, ref_alpha, ref_out, (ref_hn, ref_cn) = jax.block_until_ready(
        reference_forward(single_hm, params))

    # Tolerances account for bf16 MXU operands (f32 accumulation, f32 gate/cell math).
    RTOL, ATOL = 2e-2, 2e-2
    np.testing.assert_allclose(np.asarray(bin_output), np.asarray(ref_out), rtol=RTOL, atol=ATOL)
    np.testing.assert_allclose(np.asarray(bin_alpha), np.asarray(ref_alpha), rtol=RTOL, atol=ATOL)
    np.testing.assert_allclose(np.asarray(hm_rep), np.asarray(ref_rep), rtol=RTOL, atol=ATOL)
    np.testing.assert_allclose(np.asarray(h_n), np.asarray(ref_hn), rtol=RTOL, atol=ATOL)
    np.testing.assert_allclose(np.asarray(c_n), np.asarray(ref_cn), rtol=RTOL, atol=ATOL)

    assert hm_rep.shape == (BATCH, 1, 2 * HID)
    assert bin_alpha.shape == (BATCH, SEQ)
    assert bin_output.shape == (BATCH, SEQ, 2 * HID)
    assert h_n.shape == (2, BATCH, HID) and c_n.shape == (2, BATCH, HID)

    print("KERNEL_OK")
</pallas_src>

<mosaic_0001>
module attributes {stable_mosaic.version = 11 : i64} {
  func.func @_lstm_attn_kernel(%arg0: memref<64x48xbf16, #tpu.memory_space<vmem>>, %arg1: memref<112x256xbf16, #tpu.memory_space<vmem>>, %arg2: memref<64x1xf32, #tpu.memory_space<vmem>>, %arg3: memref<19x8x64xf32, #tpu.memory_space<vmem>>) attributes {dimension_semantics = [], scalar_prefetch = 0 : i64, scratch_operands = 0 : i64, tpu.core_type = #tpu.core_type<tc>} {
    %c0 = arith.constant 0 : index
    %c0_0 = arith.constant 0 : index
    %0 = vector.load %arg1[%c0, %c0_0] : memref<112x256xbf16, #tpu.memory_space<vmem>>, vector<48x256xbf16>
    %c48 = arith.constant 48 : index
    %c0_1 = arith.constant 0 : index
    %1 = vector.load %arg1[%c48, %c0_1] : memref<112x256xbf16, #tpu.memory_space<vmem>>, vector<64x256xbf16>
    %c0_2 = arith.constant 0 : index
    %c0_3 = arith.constant 0 : index
    %2 = vector.load %arg0[%c0_2, %c0_3] : memref<64x48xbf16, #tpu.memory_space<vmem>>, vector<64x48xbf16>
    %cst = arith.constant dense<0.000000e+00> : vector<64x256xf32>
    %3 = tpu.matmul %2, %0, %cst {dimension_numbers = #tpu.dot_dimension_numbers<[1], [0], [0], [1], [0, 0, 1, 1], [], []>} : vector<64x48xbf16>, vector<48x256xbf16>, vector<64x256xf32> -> vector<64x256xf32>
    %4 = vector.shape_cast %3 : vector<64x256xf32> to vector<8x8x256xf32>
    %5 = tpu.iota {dimensions = array<i32: 1>} : vector<8x256xi32>
    %c128_i32 = arith.constant 128 : i32
    %6 = vector.broadcast %c128_i32 : i32 to vector<8x256xi32>
    %7 = arith.cmpi sge, %5, %6 : vector<8x256xi32>
    %c192_i32 = arith.constant 192 : i32
    %8 = vector.broadcast %c192_i32 : i32 to vector<8x256xi32>
    %9 = arith.cmpi slt, %5, %8 : vector<8x256xi32>
    %10 = arith.andi %7, %9 : vector<8x256xi1>
    %11 = tpu.iota {dimensions = array<i32: 1>} : vector<8x64xi32>
    %c32_i32 = arith.constant 32 : i32
    %12 = vector.broadcast %c32_i32 : i32 to vector<8x64xi32>
    %13 = arith.cmpi slt, %11, %12 : vector<8x64xi32>
    %cst_4 = arith.constant 0.000000e+00 : bf16
    %14 = vector.broadcast %cst_4 : bf16 to vector<8x64xbf16>
    %cst_5 = arith.constant 0.000000e+00 : f32
    %15 = vector.broadcast %cst_5 : f32 to vector<8x64xf32>
    %16 = vector.extract_strided_slice %4 {offsets = [0, 0, 0], sizes = [1, 8, 256], strides = [1, 1, 1]} : vector<8x8x256xf32> to vector<1x8x256xf32>
    %17 = vector.shape_cast %16 : vector<1x8x256xf32> to vector<8x256xf32>
    %cst_6 = arith.constant dense<0.000000e+00> : vector<8x256xf32>
    %18 = tpu.matmul %14, %1, %cst_6 {dimension_numbers = #tpu.dot_dimension_numbers<[1], [0], [0], [1], [0, 0, 1, 1], [], []>} : vector<8x64xbf16>, vector<64x256xbf16>, vector<8x256xf32> -> vector<8x256xf32>
    %19 = arith.addf %17, %18 : vector<8x256xf32>
    %cst_7 = arith.constant 5.000000e-01 : f32
    %20 = vector.broadcast %cst_7 : f32 to vector<8x256xf32>
    %21 = arith.mulf %20, %19 : vector<8x256xf32>
    %22 = arith.select %10, %19, %21 : vector<8x256xi1>, vector<8x256xf32>
    %23 = math.tanh %22 : vector<8x256xf32>
    %cst_8 = arith.constant 5.000000e-01 : f32
    %24 = vector.broadcast %cst_8 : f32 to vector<8x256xf32>
    %25 = arith.mulf %24, %23 : vector<8x256xf32>
    %cst_9 = arith.constant 5.000000e-01 : f32
    %26 = vector.broadcast %cst_9 : f32 to vector<8x256xf32>
    %27 = arith.addf %25, %26 : vector<8x256xf32>
    %28 = arith.select %10, %23, %27 : vector<8x256xi1>, vector<8x256xf32>
    %29 = vector.extract_strided_slice %28 {offsets = [0, 0], sizes = [8, 64], strides = [1, 1]} : vector<8x256xf32> to vector<8x64xf32>
    %30 = vector.extract_strided_slice %28 {offsets = [0, 64], sizes = [8, 64], strides = [1, 1]} : vector<8x256xf32> to vector<8x64xf32>
    %31 = vector.extract_strided_slice %28 {offsets = [0, 128], sizes = [8, 64], strides = [1, 1]} : vector<8x256xf32> to vector<8x64xf32>
    %32 = vector.extract_strided_slice %28 {offsets = [0, 192], sizes = [8, 64], strides = [1, 1]} : vector<8x256xf32> to vector<8x64xf32>
    %33 = arith.mulf %30, %15 : vector<8x64xf32>
    %34 = arith.mulf %29, %31 : vector<8x64xf32>
    %35 = arith.addf %33, %34 : vector<8x64xf32>
    %36 = math.tanh %35 : vector<8x64xf32>
    %37 = arith.mulf %32, %36 : vector<8x64xf32>
    %38 = arith.truncf %37 : vector<8x64xf32> to vector<8x64xbf16>
    %39 = vector.extract_strided_slice %4 {offsets = [1, 0, 0], sizes = [1, 8, 256], strides = [1, 1, 1]} : vector<8x8x256xf32> to vector<1x8x256xf32>
    %40 = vector.shape_cast %39 : vector<1x8x256xf32> to vector<8x256xf32>
    %cst_10 = arith.constant dense<0.000000e+00> : vector<8x256xf32>
    %41 = tpu.matmul %38, %1, %cst_10 {dimension_numbers = #tpu.dot_dimension_numbers<[1], [0], [0], [1], [0, 0, 1, 1], [], []>} : vector<8x64xbf16>, vector<64x256xbf16>, vector<8x256xf32> -> vector<8x256xf32>
    %42 = arith.addf %40, %41 : vector<8x256xf32>
    %cst_11 = arith.constant 5.000000e-01 : f32
    %43 = vector.broadcast %cst_11 : f32 to vector<8x256xf32>
    %44 = arith.mulf %43, %42 : vector<8x256xf32>
    %45 = arith.select %10, %42, %44 : vector<8x256xi1>, vector<8x256xf32>
    %46 = math.tanh %45 : vector<8x256xf32>
    %cst_12 = arith.constant 5.000000e-01 : f32
    %47 = vector.broadcast %cst_12 : f32 to vector<8x256xf32>
    %48 = arith.mulf %47, %46 : vector<8x256xf32>
    %cst_13 = arith.constant 5.000000e-01 : f32
    %49 = vector.broadcast %cst_13 : f32 to vector<8x256xf32>
    %50 = arith.addf %48, %49 : vector<8x256xf32>
    %51 = arith.select %10, %46, %50 : vector<8x256xi1>, vector<8x256xf32>
    %52 = vector.extract_strided_slice %51 {offsets = [0, 0], sizes = [8, 64], strides = [1, 1]} : vector<8x256xf32> to vector<8x64xf32>
    %53 = vector.extract_strided_slice %51 {offsets = [0, 64], sizes = [8, 64], strides = [1, 1]} : vector<8x256xf32> to vector<8x64xf32>
    %54 = vector.extract_strided_slice %51 {offsets = [0, 128], sizes = [8, 64], strides = [1, 1]} : vector<8x256xf32> to vector<8x64xf32>
    %55 = vector.extract_strided_slice %51 {offsets = [0, 192], sizes = [8, 64], strides = [1, 1]} : vector<8x256xf32> to vector<8x64xf32>
    %56 = arith.mulf %53, %35 : vector<8x64xf32>
    %57 = arith.mulf %52, %54 : vector<8x64xf32>
    %58 = arith.addf %56, %57 : vector<8x64xf32>
    %59 = math.tanh %58 : vector<8x64xf32>
    %60 = arith.mulf %55, %59 : vector<8x64xf32>
    %61 = arith.truncf %60 : vector<8x64xf32> to vector<8x64xbf16>
    %62 = vector.extract_strided_slice %4 {offsets = [2, 0, 0], sizes = [1, 8, 256], strides = [1, 1, 1]} : vector<8x8x256xf32> to vector<1x8x256xf32>
    %63 = vector.shape_cast %62 : vector<1x8x256xf32> to vector<8x256xf32>
    %cst_14 = arith.constant dense<0.000000e+00> : vector<8x256xf32>
    %64 = tpu.matmul %61, %1, %cst_14 {dimension_numbers = #tpu.dot_dimension_numbers<[1], [0], [0], [1], [0, 0, 1, 1], [], []>} : vector<8x64xbf16>, vector<64x256xbf16>, vector<8x256xf32> -> vector<8x256xf32>
    %65 = arith.addf %63, %64 : vector<8x256xf32>
    %cst_15 = arith.constant 5.000000e-01 : f32
    %66 = vector.broadcast %cst_15 : f32 to vector<8x256xf32>
    %67 = arith.mulf %66, %65 : vector<8x256xf32>
    %68 = arith.select %10, %65, %67 : vector<8x256xi1>, vector<8x256xf32>
    %69 = math.tanh %68 : vector<8x256xf32>
    %cst_16 = arith.constant 5.000000e-01 : f32
    %70 = vector.broadcast %cst_16 : f32 to vector<8x256xf32>
    %71 = arith.mulf %70, %69 : vector<8x256xf32>
    %cst_17 = arith.constant 5.000000e-01 : f32
    %72 = vector.broadcast %cst_17 : f32 to vector<8x256xf32>
    %73 = arith.addf %71, %72 : vector<8x256xf32>
    %74 = arith.select %10, %69, %73 : vector<8x256xi1>, vector<8x256xf32>
    %75 = vector.extract_strided_slice %74 {offsets = [0, 0], sizes = [8, 64], strides = [1, 1]} : vector<8x256xf32> to vector<8x64xf32>
    %76 = vector.extract_strided_slice %74 {offsets = [0, 64], sizes = [8, 64], strides = [1, 1]} : vector<8x256xf32> to vector<8x64xf32>
    %77 = vector.extract_strided_slice %74 {offsets = [0, 128], sizes = [8, 64], strides = [1, 1]} : vector<8x256xf32> to vector<8x64xf32>
    %78 = vector.extract_strided_slice %74 {offsets = [0, 192], sizes = [8, 64], strides = [1, 1]} : vector<8x256xf32> to vector<8x64xf32>
    %79 = arith.mulf %76, %58 : vector<8x64xf32>
    %80 = arith.mulf %75, %77 : vector<8x64xf32>
    %81 = arith.addf %79, %80 : vector<8x64xf32>
    %82 = math.tanh %81 : vector<8x64xf32>
    %83 = arith.mulf %78, %82 : vector<8x64xf32>
    %84 = arith.truncf %83 : vector<8x64xf32> to vector<8x64xbf16>
    %85 = vector.extract_strided_slice %4 {offsets = [3, 0, 0], sizes = [1, 8, 256], strides = [1, 1, 1]} : vector<8x8x256xf32> to vector<1x8x256xf32>
    %86 = vector.shape_cast %85 : vector<1x8x256xf32> to vector<8x256xf32>
    %cst_18 = arith.constant dense<0.000000e+00> : vector<8x256xf32>
    %87 = tpu.matmul %84, %1, %cst_18 {dimension_numbers = #tpu.dot_dimension_numbers<[1], [0], [0], [1], [0, 0, 1, 1], [], []>} : vector<8x64xbf16>, vector<64x256xbf16>, vector<8x256xf32> -> vector<8x256xf32>
    %88 = arith.addf %86, %87 : vector<8x256xf32>
    %cst_19 = arith.constant 5.000000e-01 : f32
    %89 = vector.broadcast %cst_19 : f32 to vector<8x256xf32>
    %90 = arith.mulf %89, %88 : vector<8x256xf32>
    %91 = arith.select %10, %88, %90 : vector<8x256xi1>, vector<8x256xf32>
    %92 = math.tanh %91 : vector<8x256xf32>
    %cst_20 = arith.constant 5.000000e-01 : f32
    %93 = vector.broadcast %cst_20 : f32 to vector<8x256xf32>
    %94 = arith.mulf %93, %92 : vector<8x256xf32>
    %cst_21 = arith.constant 5.000000e-01 : f32
    %95 = vector.broadcast %cst_21 : f32 to vector<8x256xf32>
    %96 = arith.addf %94, %95 : vector<8x256xf32>
    %97 = arith.select %10, %92, %96 : vector<8x256xi1>, vector<8x256xf32>
    %98 = vector.extract_strided_slice %97 {offsets = [0, 0], sizes = [8, 64], strides = [1, 1]} : vector<8x256xf32> to vector<8x64xf32>
    %99 = vector.extract_strided_slice %97 {offsets = [0, 64], sizes = [8, 64], strides = [1, 1]} : vector<8x256xf32> to vector<8x64xf32>
    %100 = vector.extract_strided_slice %97 {offsets = [0, 128], sizes = [8, 64], strides = [1, 1]} : vector<8x256xf32> to vector<8x64xf32>
    %101 = vector.extract_strided_slice %97 {offsets = [0, 192], sizes = [8, 64], strides = [1, 1]} : vector<8x256xf32> to vector<8x64xf32>
    %102 = arith.mulf %99, %81 : vector<8x64xf32>
    %103 = arith.mulf %98, %100 : vector<8x64xf32>
    %104 = arith.addf %102, %103 : vector<8x64xf32>
    %105 = math.tanh %104 : vector<8x64xf32>
    %106 = arith.mulf %101, %105 : vector<8x64xf32>
    %107 = arith.truncf %106 : vector<8x64xf32> to vector<8x64xbf16>
    %108 = vector.extract_strided_slice %4 {offsets = [4, 0, 0], sizes = [1, 8, 256], strides = [1, 1, 1]} : vector<8x8x256xf32> to vector<1x8x256xf32>
    %109 = vector.shape_cast %108 : vector<1x8x256xf32> to vector<8x256xf32>
    %cst_22 = arith.constant dense<0.000000e+00> : vector<8x256xf32>
    %110 = tpu.matmul %107, %1, %cst_22 {dimension_numbers = #tpu.dot_dimension_numbers<[1], [0], [0], [1], [0, 0, 1, 1], [], []>} : vector<8x64xbf16>, vector<64x256xbf16>, vector<8x256xf32> -> vector<8x256xf32>
    %111 = arith.addf %109, %110 : vector<8x256xf32>
    %cst_23 = arith.constant 5.000000e-01 : f32
    %112 = vector.broadcast %cst_23 : f32 to vector<8x256xf32>
    %113 = arith.mulf %112, %111 : vector<8x256xf32>
    %114 = arith.select %10, %111, %113 : vector<8x256xi1>, vector<8x256xf32>
    %115 = math.tanh %114 : vector<8x256xf32>
    %cst_24 = arith.constant 5.000000e-01 : f32
    %116 = vector.broadcast %cst_24 : f32 to vector<8x256xf32>
    %117 = arith.mulf %116, %115 : vector<8x256xf32>
    %cst_25 = arith.constant 5.000000e-01 : f32
    %118 = vector.broadcast %cst_25 : f32 to vector<8x256xf32>
    %119 = arith.addf %117, %118 : vector<8x256xf32>
    %120 = arith.select %10, %115, %119 : vector<8x256xi1>, vector<8x256xf32>
    %121 = vector.extract_strided_slice %120 {offsets = [0, 0], sizes = [8, 64], strides = [1, 1]} : vector<8x256xf32> to vector<8x64xf32>
    %122 = vector.extract_strided_slice %120 {offsets = [0, 64], sizes = [8, 64], strides = [1, 1]} : vector<8x256xf32> to vector<8x64xf32>
    %123 = vector.extract_strided_slice %120 {offsets = [0, 128], sizes = [8, 64], strides = [1, 1]} : vector<8x256xf32> to vector<8x64xf32>
    %124 = vector.extract_strided_slice %120 {offsets = [0, 192], sizes = [8, 64], strides = [1, 1]} : vector<8x256xf32> to vector<8x64xf32>
    %125 = arith.mulf %122, %104 : vector<8x64xf32>
    %126 = arith.mulf %121, %123 : vector<8x64xf32>
    %127 = arith.addf %125, %126 : vector<8x64xf32>
    %128 = math.tanh %127 : vector<8x64xf32>
    %129 = arith.mulf %124, %128 : vector<8x64xf32>
    %130 = arith.truncf %129 : vector<8x64xf32> to vector<8x64xbf16>
    %131 = vector.extract_strided_slice %4 {offsets = [5, 0, 0], sizes = [1, 8, 256], strides = [1, 1, 1]} : vector<8x8x256xf32> to vector<1x8x256xf32>
    %132 = vector.shape_cast %131 : vector<1x8x256xf32> to vector<8x256xf32>
    %cst_26 = arith.constant dense<0.000000e+00> : vector<8x256xf32>
    %133 = tpu.matmul %130, %1, %cst_26 {dimension_numbers = #tpu.dot_dimension_numbers<[1], [0], [0], [1], [0, 0, 1, 1], [], []>} : vector<8x64xbf16>, vector<64x256xbf16>, vector<8x256xf32> -> vector<8x256xf32>
    %134 = arith.addf %132, %133 : vector<8x256xf32>
    %cst_27 = arith.constant 5.000000e-01 : f32
    %135 = vector.broadcast %cst_27 : f32 to vector<8x256xf32>
    %136 = arith.mulf %135, %134 : vector<8x256xf32>
    %137 = arith.select %10, %134, %136 : vector<8x256xi1>, vector<8x256xf32>
    %138 = math.tanh %137 : vector<8x256xf32>
    %cst_28 = arith.constant 5.000000e-01 : f32
    %139 = vector.broadcast %cst_28 : f32 to vector<8x256xf32>
    %140 = arith.mulf %139, %138 : vector<8x256xf32>
    %cst_29 = arith.constant 5.000000e-01 : f32
    %141 = vector.broadcast %cst_29 : f32 to vector<8x256xf32>
    %142 = arith.addf %140, %141 : vector<8x256xf32>
    %143 = arith.select %10, %138, %142 : vector<8x256xi1>, vector<8x256xf32>
    %144 = vector.extract_strided_slice %143 {offsets = [0, 0], sizes = [8, 64], strides = [1, 1]} : vector<8x256xf32> to vector<8x64xf32>
    %145 = vector.extract_strided_slice %143 {offsets = [0, 64], sizes = [8, 64], strides = [1, 1]} : vector<8x256xf32> to vector<8x64xf32>
    %146 = vector.extract_strided_slice %143 {offsets = [0, 128], sizes = [8, 64], strides = [1, 1]} : vector<8x256xf32> to vector<8x64xf32>
    %147 = vector.extract_strided_slice %143 {offsets = [0, 192], sizes = [8, 64], strides = [1, 1]} : vector<8x256xf32> to vector<8x64xf32>
    %148 = arith.mulf %145, %127 : vector<8x64xf32>
    %149 = arith.mulf %144, %146 : vector<8x64xf32>
    %150 = arith.addf %148, %149 : vector<8x64xf32>
    %151 = math.tanh %150 : vector<8x64xf32>
    %152 = arith.mulf %147, %151 : vector<8x64xf32>
    %153 = arith.truncf %152 : vector<8x64xf32> to vector<8x64xbf16>
    %154 = vector.extract_strided_slice %4 {offsets = [6, 0, 0], sizes = [1, 8, 256], strides = [1, 1, 1]} : vector<8x8x256xf32> to vector<1x8x256xf32>
    %155 = vector.shape_cast %154 : vector<1x8x256xf32> to vector<8x256xf32>
    %cst_30 = arith.constant dense<0.000000e+00> : vector<8x256xf32>
    %156 = tpu.matmul %153, %1, %cst_30 {dimension_numbers = #tpu.dot_dimension_numbers<[1], [0], [0], [1], [0, 0, 1, 1], [], []>} : vector<8x64xbf16>, vector<64x256xbf16>, vector<8x256xf32> -> vector<8x256xf32>
    %157 = arith.addf %155, %156 : vector<8x256xf32>
    %cst_31 = arith.constant 5.000000e-01 : f32
    %158 = vector.broadcast %cst_31 : f32 to vector<8x256xf32>
    %159 = arith.mulf %158, %157 : vector<8x256xf32>
    %160 = arith.select %10, %157, %159 : vector<8x256xi1>, vector<8x256xf32>
    %161 = math.tanh %160 : vector<8x256xf32>
    %cst_32 = arith.constant 5.000000e-01 : f32
    %162 = vector.broadcast %cst_32 : f32 to vector<8x256xf32>
    %163 = arith.mulf %162, %161 : vector<8x256xf32>
    %cst_33 = arith.constant 5.000000e-01 : f32
    %164 = vector.broadcast %cst_33 : f32 to vector<8x256xf32>
    %165 = arith.addf %163, %164 : vector<8x256xf32>
    %166 = arith.select %10, %161, %165 : vector<8x256xi1>, vector<8x256xf32>
    %167 = vector.extract_strided_slice %166 {offsets = [0, 0], sizes = [8, 64], strides = [1, 1]} : vector<8x256xf32> to vector<8x64xf32>
    %168 = vector.extract_strided_slice %166 {offsets = [0, 64], sizes = [8, 64], strides = [1, 1]} : vector<8x256xf32> to vector<8x64xf32>
    %169 = vector.extract_strided_slice %166 {offsets = [0, 128], sizes = [8, 64], strides = [1, 1]} : vector<8x256xf32> to vector<8x64xf32>
    %170 = vector.extract_strided_slice %166 {offsets = [0, 192], sizes = [8, 64], strides = [1, 1]} : vector<8x256xf32> to vector<8x64xf32>
    %171 = arith.mulf %168, %150 : vector<8x64xf32>
    %172 = arith.mulf %167, %169 : vector<8x64xf32>
    %173 = arith.addf %171, %172 : vector<8x64xf32>
    %174 = math.tanh %173 : vector<8x64xf32>
    %175 = arith.mulf %170, %174 : vector<8x64xf32>
    %176 = arith.truncf %175 : vector<8x64xf32> to vector<8x64xbf16>
    %177 = vector.extract_strided_slice %4 {offsets = [7, 0, 0], sizes = [1, 8, 256], strides = [1, 1, 1]} : vector<8x8x256xf32> to vector<1x8x256xf32>
    %178 = vector.shape_cast %177 : vector<1x8x256xf32> to vector<8x256xf32>
    %cst_34 = arith.constant dense<0.000000e+00> : vector<8x256xf32>
    %179 = tpu.matmul %176, %1, %cst_34 {dimension_numbers = #tpu.dot_dimension_numbers<[1], [0], [0], [1], [0, 0, 1, 1], [], []>} : vector<8x64xbf16>, vector<64x256xbf16>, vector<8x256xf32> -> vector<8x256xf32>
    %180 = arith.addf %178, %179 : vector<8x256xf32>
    %cst_35 = arith.constant 5.000000e-01 : f32
    %181 = vector.broadcast %cst_35 : f32 to vector<8x256xf32>
    %182 = arith.mulf %181, %180 : vector<8x256xf32>
    %183 = arith.select %10, %180, %182 : vector<8x256xi1>, vector<8x256xf32>
    %184 = math.tanh %183 : vector<8x256xf32>
    %cst_36 = arith.constant 5.000000e-01 : f32
    %185 = vector.broadcast %cst_36 : f32 to vector<8x256xf32>
    %186 = arith.mulf %185, %184 : vector<8x256xf32>
    %cst_37 = arith.constant 5.000000e-01 : f32
    %187 = vector.broadcast %cst_37 : f32 to vector<8x256xf32>
    %188 = arith.addf %186, %187 : vector<8x256xf32>
    %189 = arith.select %10, %184, %188 : vector<8x256xi1>, vector<8x256xf32>
    %190 = vector.extract_strided_slice %189 {offsets = [0, 0], sizes = [8, 64], strides = [1, 1]} : vector<8x256xf32> to vector<8x64xf32>
    %191 = vector.extract_strided_slice %189 {offsets = [0, 64], sizes = [8, 64], strides = [1, 1]} : vector<8x256xf32> to vector<8x64xf32>
    %192 = vector.extract_strided_slice %189 {offsets = [0, 128], sizes = [8, 64], strides = [1, 1]} : vector<8x256xf32> to vector<8x64xf32>
    %193 = vector.extract_strided_slice %189 {offsets = [0, 192], sizes = [8, 64], strides = [1, 1]} : vector<8x256xf32> to vector<8x64xf32>
    %194 = arith.mulf %191, %173 : vector<8x64xf32>
    %195 = arith.mulf %190, %192 : vector<8x64xf32>
    %196 = arith.addf %194, %195 : vector<8x64xf32>
    %197 = math.tanh %196 : vector<8x64xf32>
    %198 = arith.mulf %193, %197 : vector<8x64xf32>
    %199 = arith.select %13, %37, %198 : vector<8x64xi1>, vector<8x64xf32>
    %200 = arith.select %13, %60, %175 : vector<8x64xi1>, vector<8x64xf32>
    %201 = arith.select %13, %83, %152 : vector<8x64xi1>, vector<8x64xf32>
    %202 = arith.select %13, %106, %129 : vector<8x64xi1>, vector<8x64xf32>
    %203 = arith.select %13, %129, %106 : vector<8x64xi1>, vector<8x64xf32>
    %204 = arith.select %13, %152, %83 : vector<8x64xi1>, vector<8x64xf32>
    %205 = arith.select %13, %175, %60 : vector<8x64xi1>, vector<8x64xf32>
    %206 = arith.select %13, %198, %37 : vector<8x64xi1>, vector<8x64xf32>
    %c0_38 = arith.constant 0 : index
    %c0_39 = arith.constant 0 : index
    %207 = vector.load %arg2[%c0_38, %c0_39] : memref<64x1xf32, #tpu.memory_space<vmem>>, vector<64x1xf32>
    %cst_40 = arith.constant dense<0.000000e+00> : vector<8x1xf32>
    %208 = tpu.matmul %199, %207, %cst_40 {dimension_numbers = #tpu.dot_dimension_numbers<[1], [0], [0], [1], [0, 0, 1, 1], [], []>} : vector<8x64xf32>, vector<64x1xf32>, vector<8x1xf32> -> vector<8x1xf32>
    %cst_41 = arith.constant dense<0.000000e+00> : vector<8x1xf32>
    %209 = tpu.matmul %200, %207, %cst_41 {dimension_numbers = #tpu.dot_dimension_numbers<[1], [0], [0], [1], [0, 0, 1, 1], [], []>} : vector<8x64xf32>, vector<64x1xf32>, vector<8x1xf32> -> vector<8x1xf32>
    %cst_42 = arith.constant dense<0.000000e+00> : vector<8x1xf32>
    %210 = tpu.matmul %201, %207, %cst_42 {dimension_numbers = #tpu.dot_dimension_numbers<[1], [0], [0], [1], [0, 0, 1, 1], [], []>} : vector<8x64xf32>, vector<64x1xf32>, vector<8x1xf32> -> vector<8x1xf32>
    %cst_43 = arith.constant dense<0.000000e+00> : vector<8x1xf32>
    %211 = tpu.matmul %202, %207, %cst_43 {dimension_numbers = #tpu.dot_dimension_numbers<[1], [0], [0], [1], [0, 0, 1, 1], [], []>} : vector<8x64xf32>, vector<64x1xf32>, vector<8x1xf32> -> vector<8x1xf32>
    %cst_44 = arith.constant dense<0.000000e+00> : vector<8x1xf32>
    %212 = tpu.matmul %203, %207, %cst_44 {dimension_numbers = #tpu.dot_dimension_numbers<[1], [0], [0], [1], [0, 0, 1, 1], [], []>} : vector<8x64xf32>, vector<64x1xf32>, vector<8x1xf32> -> vector<8x1xf32>
    %cst_45 = arith.constant dense<0.000000e+00> : vector<8x1xf32>
    %213 = tpu.matmul %204, %207, %cst_45 {dimension_numbers = #tpu.dot_dimension_numbers<[1], [0], [0], [1], [0, 0, 1, 1], [], []>} : vector<8x64xf32>, vector<64x1xf32>, vector<8x1xf32> -> vector<8x1xf32>
    %cst_46 = arith.constant dense<0.000000e+00> : vector<8x1xf32>
    %214 = tpu.matmul %205, %207, %cst_46 {dimension_numbers = #tpu.dot_dimension_numbers<[1], [0], [0], [1], [0, 0, 1, 1], [], []>} : vector<8x64xf32>, vector<64x1xf32>, vector<8x1xf32> -> vector<8x1xf32>
    %cst_47 = arith.constant dense<0.000000e+00> : vector<8x1xf32>
    %215 = tpu.matmul %206, %207, %cst_47 {dimension_numbers = #tpu.dot_dimension_numbers<[1], [0], [0], [1], [0, 0, 1, 1], [], []>} : vector<8x64xf32>, vector<64x1xf32>, vector<8x1xf32> -> vector<8x1xf32>
    %216 = arith.maximumf %208, %209 : vector<8x1xf32>
    %217 = arith.maximumf %216, %210 : vector<8x1xf32>
    %218 = arith.maximumf %217, %211 : vector<8x1xf32>
    %219 = arith.maximumf %218, %212 : vector<8x1xf32>
    %220 = arith.maximumf %219, %213 : vector<8x1xf32>
    %221 = arith.maximumf %220, %214 : vector<8x1xf32>
    %222 = arith.maximumf %221, %215 : vector<8x1xf32>
    %223 = arith.subf %208, %222 : vector<8x1xf32>
    %224 = math.exp %223 : vector<8x1xf32>
    %225 = arith.subf %209, %222 : vector<8x1xf32>
    %226 = math.exp %225 : vector<8x1xf32>
    %227 = arith.subf %210, %222 : vector<8x1xf32>
    %228 = math.exp %227 : vector<8x1xf32>
    %229 = arith.subf %211, %222 : vector<8x1xf32>
    %230 = math.exp %229 : vector<8x1xf32>
    %231 = arith.subf %212, %222 : vector<8x1xf32>
    %232 = math.exp %231 : vector<8x1xf32>
    %233 = arith.subf %213, %222 : vector<8x1xf32>
    %234 = math.exp %233 : vector<8x1xf32>
    %235 = arith.subf %214, %222 : vector<8x1xf32>
    %236 = math.exp %235 : vector<8x1xf32>
    %237 = arith.subf %215, %222 : vector<8x1xf32>
    %238 = math.exp %237 : vector<8x1xf32>
    %239 = arith.addf %224, %226 : vector<8x1xf32>
    %240 = arith.addf %239, %228 : vector<8x1xf32>
    %241 = arith.addf %240, %230 : vector<8x1xf32>
    %242 = arith.addf %241, %232 : vector<8x1xf32>
    %243 = arith.addf %242, %234 : vector<8x1xf32>
    %244 = arith.addf %243, %236 : vector<8x1xf32>
    %245 = arith.addf %244, %238 : vector<8x1xf32>
    %cst_48 = arith.constant 1.000000e+00 : f32
    %246 = vector.broadcast %cst_48 : f32 to vector<8x1xf32>
    %247 = arith.divf %246, %245 : vector<8x1xf32>
    %248 = arith.mulf %224, %247 : vector<8x1xf32>
    %249 = arith.mulf %226, %247 : vector<8x1xf32>
    %250 = arith.mulf %228, %247 : vector<8x1xf32>
    %251 = arith.mulf %230, %247 : vector<8x1xf32>
    %252 = arith.mulf %232, %247 : vector<8x1xf32>
    %253 = arith.mulf %234, %247 : vector<8x1xf32>
    %254 = arith.mulf %236, %247 : vector<8x1xf32>
    %255 = arith.mulf %238, %247 : vector<8x1xf32>
    %256 = vector.broadcast %248 : vector<8x1xf32> to vector<8x64xf32>
    %257 = arith.mulf %256, %199 : vector<8x64xf32>
    %258 = vector.broadcast %249 : vector<8x1xf32> to vector<8x64xf32>
    %259 = arith.mulf %258, %200 : vector<8x64xf32>
    %260 = arith.addf %257, %259 : vector<8x64xf32>
    %261 = vector.broadcast %250 : vector<8x1xf32> to vector<8x64xf32>
    %262 = arith.mulf %261, %201 : vector<8x64xf32>
    %263 = arith.addf %260, %262 : vector<8x64xf32>
    %264 = vector.broadcast %251 : vector<8x1xf32> to vector<8x64xf32>
    %265 = arith.mulf %264, %202 : vector<8x64xf32>
    %266 = arith.addf %263, %265 : vector<8x64xf32>
    %267 = vector.broadcast %252 : vector<8x1xf32> to vector<8x64xf32>
    %268 = arith.mulf %267, %203 : vector<8x64xf32>
    %269 = arith.addf %266, %268 : vector<8x64xf32>
    %270 = vector.broadcast %253 : vector<8x1xf32> to vector<8x64xf32>
    %271 = arith.mulf %270, %204 : vector<8x64xf32>
    %272 = arith.addf %269, %271 : vector<8x64xf32>
    %273 = vector.broadcast %254 : vector<8x1xf32> to vector<8x64xf32>
    %274 = arith.mulf %273, %205 : vector<8x64xf32>
    %275 = arith.addf %272, %274 : vector<8x64xf32>
    %276 = vector.broadcast %255 : vector<8x1xf32> to vector<8x64xf32>
    %277 = arith.mulf %276, %206 : vector<8x64xf32>
    %278 = arith.addf %275, %277 : vector<8x64xf32>
    %c0_49 = arith.constant 0 : index
    %c0_50 = arith.constant 0 : index
    %c0_51 = arith.constant 0 : index
    %279 = vector.load %arg3[%c0_49, %c0_50, %c0_51] : memref<19x8x64xf32, #tpu.memory_space<vmem>>, vector<1x8x64xf32>
    %280 = vector.shape_cast %279 : vector<1x8x64xf32> to vector<8x64xf32>
    %281 = vector.shape_cast %199 : vector<8x64xf32> to vector<1x8x64xf32>
    tpu.vector_store %arg3[%c0_49, %c0_50, %c0_51], %281 {strides = array<i32>} : memref<19x8x64xf32, #tpu.memory_space<vmem>>, vector<1x8x64xf32>,
    %c1 = arith.constant 1 : index
    %c0_52 = arith.constant 0 : index
    %c0_53 = arith.constant 0 : index
    %282 = vector.load %arg3[%c1, %c0_52, %c0_53] : memref<19x8x64xf32, #tpu.memory_space<vmem>>, vector<1x8x64xf32>
    %283 = vector.shape_cast %282 : vector<1x8x64xf32> to vector<8x64xf32>
    %284 = vector.shape_cast %200 : vector<8x64xf32> to vector<1x8x64xf32>
    tpu.vector_store %arg3[%c1, %c0_52, %c0_53], %284 {strides = array<i32>} : memref<19x8x64xf32, #tpu.memory_space<vmem>>, vector<1x8x64xf32>,
    %c2 = arith.constant 2 : index
    %c0_54 = arith.constant 0 : index
    %c0_55 = arith.constant 0 : index
    %285 = vector.load %arg3[%c2, %c0_54, %c0_55] : memref<19x8x64xf32, #tpu.memory_space<vmem>>, vector<1x8x64xf32>
    %286 = vector.shape_cast %285 : vector<1x8x64xf32> to vector<8x64xf32>
    %287 = vector.shape_cast %201 : vector<8x64xf32> to vector<1x8x64xf32>
    tpu.vector_store %arg3[%c2, %c0_54, %c0_55], %287 {strides = array<i32>} : memref<19x8x64xf32, #tpu.memory_space<vmem>>, vector<1x8x64xf32>,
    %c3 = arith.constant 3 : index
    %c0_56 = arith.constant 0 : index
    %c0_57 = arith.constant 0 : index
    %288 = vector.load %arg3[%c3, %c0_56, %c0_57] : memref<19x8x64xf32, #tpu.memory_space<vmem>>, vector<1x8x64xf32>
    %289 = vector.shape_cast %288 : vector<1x8x64xf32> to vector<8x64xf32>
    %290 = vector.shape_cast %202 : vector<8x64xf32> to vector<1x8x64xf32>
    tpu.vector_store %arg3[%c3, %c0_56, %c0_57], %290 {strides = array<i32>} : memref<19x8x64xf32, #tpu.memory_space<vmem>>, vector<1x8x64xf32>,
    %c4 = arith.constant 4 : index
    %c0_58 = arith.constant 0 : index
    %c0_59 = arith.constant 0 : index
    %291 = vector.load %arg3[%c4, %c0_58, %c0_59] : memref<19x8x64xf32, #tpu.memory_space<vmem>>, vector<1x8x64xf32>
    %292 = vector.shape_cast %291 : vector<1x8x64xf32> to vector<8x64xf32>
    %293 = vector.shape_cast %203 : vector<8x64xf32> to vector<1x8x64xf32>
    tpu.vector_store %arg3[%c4, %c0_58, %c0_59], %293 {strides = array<i32>} : memref<19x8x64xf32, #tpu.memory_space<vmem>>, vector<1x8x64xf32>,
    %c5 = arith.constant 5 : index
    %c0_60 = arith.constant 0 : index
    %c0_61 = arith.constant 0 : index
    %294 = vector.load %arg3[%c5, %c0_60, %c0_61] : memref<19x8x64xf32, #tpu.memory_space<vmem>>, vector<1x8x64xf32>
    %295 = vector.shape_cast %294 : vector<1x8x64xf32> to vector<8x64xf32>
    %296 = vector.shape_cast %204 : vector<8x64xf32> to vector<1x8x64xf32>
    tpu.vector_store %arg3[%c5, %c0_60, %c0_61], %296 {strides = array<i32>} : memref<19x8x64xf32, #tpu.memory_space<vmem>>, vector<1x8x64xf32>,
    %c6 = arith.constant 6 : index
    %c0_62 = arith.constant 0 : index
    %c0_63 = arith.constant 0 : index
    %297 = vector.load %arg3[%c6, %c0_62, %c0_63] : memref<19x8x64xf32, #tpu.memory_space<vmem>>, vector<1x8x64xf32>
    %298 = vector.shape_cast %297 : vector<1x8x64xf32> to vector<8x64xf32>
    %299 = vector.shape_cast %205 : vector<8x64xf32> to vector<1x8x64xf32>
    tpu.vector_store %arg3[%c6, %c0_62, %c0_63], %299 {strides = array<i32>} : memref<19x8x64xf32, #tpu.memory_space<vmem>>, vector<1x8x64xf32>,
    %c7 = arith.constant 7 : index
    %c0_64 = arith.constant 0 : index
    %c0_65 = arith.constant 0 : index
    %300 = vector.load %arg3[%c7, %c0_64, %c0_65] : memref<19x8x64xf32, #tpu.memory_space<vmem>>, vector<1x8x64xf32>
    %301 = vector.shape_cast %300 : vector<1x8x64xf32> to vector<8x64xf32>
    %302 = vector.shape_cast %206 : vector<8x64xf32> to vector<1x8x64xf32>
    tpu.vector_store %arg3[%c7, %c0_64, %c0_65], %302 {strides = array<i32>} : memref<19x8x64xf32, #tpu.memory_space<vmem>>, vector<1x8x64xf32>,
    %c8 = arith.constant 8 : index
    %c0_66 = arith.constant 0 : index
    %c0_67 = arith.constant 0 : index
    %303 = vector.load %arg3[%c8, %c0_66, %c0_67] : memref<19x8x64xf32, #tpu.memory_space<vmem>>, vector<1x8x64xf32>
    %304 = vector.shape_cast %303 : vector<1x8x64xf32> to vector<8x64xf32>
    %305 = vector.shape_cast %278 : vector<8x64xf32> to vector<1x8x64xf32>
    tpu.vector_store %arg3[%c8, %c0_66, %c0_67], %305 {strides = array<i32>} : memref<19x8x64xf32, #tpu.memory_space<vmem>>, vector<1x8x64xf32>,
    %c9 = arith.constant 9 : index
    %c0_68 = arith.constant 0 : index
    %c0_69 = arith.constant 0 : index
    %306 = vector.load %arg3[%c9, %c0_68, %c0_69] : memref<19x8x64xf32, #tpu.memory_space<vmem>>, vector<1x8x64xf32>
    %307 = vector.shape_cast %306 : vector<1x8x64xf32> to vector<8x64xf32>
    %308 = vector.shape_cast %198 : vector<8x64xf32> to vector<1x8x64xf32>
    tpu.vector_store %arg3[%c9, %c0_68, %c0_69], %308 {strides = array<i32>} : memref<19x8x64xf32, #tpu.memory_space<vmem>>, vector<1x8x64xf32>,
    %c10 = arith.constant 10 : index
    %c0_70 = arith.constant 0 : index
    %c0_71 = arith.constant 0 : index
    %309 = vector.load %arg3[%c10, %c0_70, %c0_71] : memref<19x8x64xf32, #tpu.memory_space<vmem>>, vector<1x8x64xf32>
    %310 = vector.shape_cast %309 : vector<1x8x64xf32> to vector<8x64xf32>
    %311 = vector.shape_cast %196 : vector<8x64xf32> to vector<1x8x64xf32>
    tpu.vector_store %arg3[%c10, %c0_70, %c0_71], %311 {strides = array<i32>} : memref<19x8x64xf32, #tpu.memory_space<vmem>>, vector<1x8x64xf32>,
    %312 = vector.shape_cast %248 : vector<8x1xf32> to vector<8x1xf32>
    %313 = vector.broadcast %312 : vector<8x1xf32> to vector<8x64xf32>
    %c11 = arith.constant 11 : index
    %c0_72 = arith.constant 0 : index
    %c0_73 = arith.constant 0 : index
    %314 = vector.load %arg3[%c11, %c0_72, %c0_73] : memref<19x8x64xf32, #tpu.memory_space<vmem>>, vector<1x8x64xf32>
    %315 = vector.shape_cast %314 : vector<1x8x64xf32> to vector<8x64xf32>
    %316 = vector.shape_cast %313 : vector<8x64xf32> to vector<1x8x64xf32>
    tpu.vector_store %arg3[%c11, %c0_72, %c0_73], %316 {strides = array<i32>} : memref<19x8x64xf32, #tpu.memory_space<vmem>>, vector<1x8x64xf32>,
    %317 = vector.shape_cast %249 : vector<8x1xf32> to vector<8x1xf32>
    %318 = vector.broadcast %317 : vector<8x1xf32> to vector<8x64xf32>
    %c12 = arith.constant 12 : index
    %c0_74 = arith.constant 0 : index
    %c0_75 = arith.constant 0 : index
    %319 = vector.load %arg3[%c12, %c0_74, %c0_75] : memref<19x8x64xf32, #tpu.memory_space<vmem>>, vector<1x8x64xf32>
    %320 = vector.shape_cast %319 : vector<1x8x64xf32> to vector<8x64xf32>
    %321 = vector.shape_cast %318 : vector<8x64xf32> to vector<1x8x64xf32>
    tpu.vector_store %arg3[%c12, %c0_74, %c0_75], %321 {strides = array<i32>} : memref<19x8x64xf32, #tpu.memory_space<vmem>>, vector<1x8x64xf32>,
    %322 = vector.shape_cast %250 : vector<8x1xf32> to vector<8x1xf32>
    %323 = vector.broadcast %322 : vector<8x1xf32> to vector<8x64xf32>
    %c13 = arith.constant 13 : index
    %c0_76 = arith.constant 0 : index
    %c0_77 = arith.constant 0 : index
    %324 = vector.load %arg3[%c13, %c0_76, %c0_77] : memref<19x8x64xf32, #tpu.memory_space<vmem>>, vector<1x8x64xf32>
    %325 = vector.shape_cast %324 : vector<1x8x64xf32> to vector<8x64xf32>
    %326 = vector.shape_cast %323 : vector<8x64xf32> to vector<1x8x64xf32>
    tpu.vector_store %arg3[%c13, %c0_76, %c0_77], %326 {strides = array<i32>} : memref<19x8x64xf32, #tpu.memory_space<vmem>>, vector<1x8x64xf32>,
    %327 = vector.shape_cast %251 : vector<8x1xf32> to vector<8x1xf32>
    %328 = vector.broadcast %327 : vector<8x1xf32> to vector<8x64xf32>
    %c14 = arith.constant 14 : index
    %c0_78 = arith.constant 0 : index
    %c0_79 = arith.constant 0 : index
    %329 = vector.load %arg3[%c14, %c0_78, %c0_79] : memref<19x8x64xf32, #tpu.memory_space<vmem>>, vector<1x8x64xf32>
    %330 = vector.shape_cast %329 : vector<1x8x64xf32> to vector<8x64xf32>
    %331 = vector.shape_cast %328 : vector<8x64xf32> to vector<1x8x64xf32>
    tpu.vector_store %arg3[%c14, %c0_78, %c0_79], %331 {strides = array<i32>} : memref<19x8x64xf32, #tpu.memory_space<vmem>>, vector<1x8x64xf32>,
    %332 = vector.shape_cast %252 : vector<8x1xf32> to vector<8x1xf32>
    %333 = vector.broadcast %332 : vector<8x1xf32> to vector<8x64xf32>
    %c15 = arith.constant 15 : index
    %c0_80 = arith.constant 0 : index
    %c0_81 = arith.constant 0 : index
    %334 = vector.load %arg3[%c15, %c0_80, %c0_81] : memref<19x8x64xf32, #tpu.memory_space<vmem>>, vector<1x8x64xf32>
    %335 = vector.shape_cast %334 : vector<1x8x64xf32> to vector<8x64xf32>
    %336 = vector.shape_cast %333 : vector<8x64xf32> to vector<1x8x64xf32>
    tpu.vector_store %arg3[%c15, %c0_80, %c0_81], %336 {strides = array<i32>} : memref<19x8x64xf32, #tpu.memory_space<vmem>>, vector<1x8x64xf32>,
    %337 = vector.shape_cast %253 : vector<8x1xf32> to vector<8x1xf32>
    %338 = vector.broadcast %337 : vector<8x1xf32> to vector<8x64xf32>
    %c16 = arith.constant 16 : index
    %c0_82 = arith.constant 0 : index
    %c0_83 = arith.constant 0 : index
    %339 = vector.load %arg3[%c16, %c0_82, %c0_83] : memref<19x8x64xf32, #tpu.memory_space<vmem>>, vector<1x8x64xf32>
    %340 = vector.shape_cast %339 : vector<1x8x64xf32> to vector<8x64xf32>
    %341 = vector.shape_cast %338 : vector<8x64xf32> to vector<1x8x64xf32>
    tpu.vector_store %arg3[%c16, %c0_82, %c0_83], %341 {strides = array<i32>} : memref<19x8x64xf32, #tpu.memory_space<vmem>>, vector<1x8x64xf32>,
    %342 = vector.shape_cast %254 : vector<8x1xf32> to vector<8x1xf32>
    %343 = vector.broadcast %342 : vector<8x1xf32> to vector<8x64xf32>
    %c17 = arith.constant 17 : index
    %c0_84 = arith.constant 0 : index
    %c0_85 = arith.constant 0 : index
    %344 = vector.load %arg3[%c17, %c0_84, %c0_85] : memref<19x8x64xf32, #tpu.memory_space<vmem>>, vector<1x8x64xf32>
    %345 = vector.shape_cast %344 : vector<1x8x64xf32> to vector<8x64xf32>
    %346 = vector.shape_cast %343 : vector<8x64xf32> to vector<1x8x64xf32>
    tpu.vector_store %arg3[%c17, %c0_84, %c0_85], %346 {strides = array<i32>} : memref<19x8x64xf32, #tpu.memory_space<vmem>>, vector<1x8x64xf32>,
    %347 = vector.shape_cast %255 : vector<8x1xf32> to vector<8x1xf32>
    %348 = vector.broadcast %347 : vector<8x1xf32> to vector<8x64xf32>
    %c18 = arith.constant 18 : index
    %c0_86 = arith.constant 0 : index
    %c0_87 = arith.constant 0 : index
    %349 = vector.load %arg3[%c18, %c0_86, %c0_87] : memref<19x8x64xf32, #tpu.memory_space<vmem>>, vector<1x8x64xf32>
    %350 = vector.shape_cast %349 : vector<1x8x64xf32> to vector<8x64xf32>
    %351 = vector.shape_cast %348 : vector<8x64xf32> to vector<1x8x64xf32>
    tpu.vector_store %arg3[%c18, %c0_86, %c0_87], %351 {strides = array<i32>} : memref<19x8x64xf32, #tpu.memory_space<vmem>>, vector<1x8x64xf32>,
    return
  }
}

</mosaic_0001>

<bundles_post_ra>
// kernel: tpu_custom_call.1
= control target key start
LH: loop header
LB: loop body
LE: loop exit
PB: predicated region body
PF: predicated region fallthrough
CT: control target
= control target key end

     0   :  { %v1281_v40 = vmov 0   ;;  %s1722_s0 = inlined_call_operand.vmem [shape: bf16[64,48], index: 0, kind: input, shape index: {}]   ;;  %s1723_s1 = inlined_call_operand.vmem [shape: bf16[112,256], index: 1, kind: input, shape index: {}]   ;;  %s1724_s2 = inlined_call_operand.vmem [shape: f32[64,1], index: 2, kind: input, shape index: {}]   ;;  %s1725_s3 = inlined_call_operand.hbm [shape: f32[19,8,64], index: 3, kind: output, shape index: {}]  }
   0x1   :  { %v1135_v0 = vld [vmem:[%s1723_s1 + $0x60] sm:$0xf]  ;;  %v1176_v1 = vld [vmem:[%s1723_s1 + $0x64] sm:$0xf0]  ;;  %v1175_v2 = vld [vmem:[%s1723_s1 + $0x64] sm:$0xf]  ;;  %1188 = vset.pattern.permute.xlu1 %v1281_v40  ;;  %1187 = vset.pattern.permute.xlu0 %v1281_v40 }
   0x2   :  { %v1315_v3 = vor.u32 %v1176_v1, %v1135_v0  ;;  %v1137_v4 = vld [vmem:[%s1723_s1 + $0x68] sm:$0xf0]  ;;  %v1167_v5 = vld [vmem:[%s1723_s1 + $0x24] sm:$0xf]  ;;  %v1095_v9 = vld [vmem:[%s1723_s1 + $0x20] sm:$0xf] }
   0x3   :  { %v1097_v6 = vld [vmem:[%s1723_s1 + $0x28] sm:$0xf0]  ;;  %v1326_v7 = vor.u32 %v1175_v2, %v1137_v4  ;;  %v1168_v10 = vld [vmem:[%s1723_s1 + $0x24] sm:$0xf0]  ;;  %v1127_v11 = vld [vmem:[%s1723_s1 + $0x50] sm:$0xf] }
   0x4   :  { %v1100_v8 = vor.u32 %v1167_v5, %v1097_v6  ;;  %217 = vmatpush.bf16.msra.mxu2 %v1315_v3  ;;  %v1096_v12 = vor.u32 %v1168_v10, %v1095_v9  ;;  %v1174_v13 = vld [vmem:[%s1723_s1 + $0x54] sm:$0xf0]  ;;  %v1173_v14 = vld [vmem:[%s1723_s1 + $0x54] sm:$0xf]  ;;  %v1129_v15 = vld [vmem:[%s1723_s1 + $0x58] sm:$0xf0] }
   0x5   :  { %230 = vmatpush.bf16.msra.mxu3 %v1326_v7  ;;  %v1348_v16 = vor.u32 %v1174_v13, %v1127_v11  ;;  %v1350_v17 = vor.u32 %v1173_v14, %v1129_v15  ;;  %v1165_v18 = vld [vmem:[%s1723_s1 + $0x14] sm:$0xf]  ;;  %v1089_v19 = vld [vmem:[%s1723_s1 + $0x18] sm:$0xf0]  ;;  %v1087_v20 = vld [vmem:[%s1723_s1 + $0x10] sm:$0xf] }
   0x6   :  { %135 = vmatpush.bf16.msra.mxu1 %v1100_v8  ;;  %106 = vmatpush.bf16.msra.mxu0 %v1096_v12  ;;  %v1092_v21 = vor.u32 %v1165_v18, %v1089_v19  ;;  %v1166_v22 = vld [vmem:[%s1723_s1 + $0x14] sm:$0xf0]  ;;  %v1119_v23 = vld [vmem:[%s1723_s1 + $0x40] sm:$0xf]  ;;  %v1172_v24 = vld [vmem:[%s1723_s1 + $0x44] sm:$0xf0] }
   0x7   :  { %v1088_v25 = vor.u32 %v1166_v22, %v1087_v20  ;;  %v1171_v26 = vld [vmem:[%s1723_s1 + $0x44] sm:$0xf]  ;;  %v1121_v27 = vld [vmem:[%s1723_s1 + $0x48] sm:$0xf0]  ;;  %v1380_v29 = vor.u32 %v1172_v24, %v1119_v23  ;;  %v1079_v31 = vld [vmem:[%s1723_s1] sm:$0xf] }
   0x8   :  { %v1163_v28 = vld [vmem:[%s1723_s1 + $0x4] sm:$0xf]  ;;  %218 = vmatpush.bf16.msra.mxu2 %v1348_v16  ;;  %v1081_v30 = vld [vmem:[%s1723_s1 + $0x8] sm:$0xf0]  ;;  %v1164_v32 = vld [vmem:[%s1723_s1 + $0x4] sm:$0xf0]  ;;  %v1392_v33 = vor.u32 %v1171_v26, %v1121_v27 }
   0x9   :  { %231 = vmatpush.bf16.msra.mxu3 %v1350_v17  ;;  %v1084_v34 = vor.u32 %v1163_v28, %v1081_v30  ;;  %v1111_v35 = vld [vmem:[%s1723_s1 + $0x30] sm:$0xf]  ;;  %v1170_v36 = vld [vmem:[%s1723_s1 + $0x34] sm:$0xf0]  ;;  %v1080_v37 = vor.u32 %v1164_v32, %v1079_v31  ;;  %v1169_v38 = vld [vmem:[%s1723_s1 + $0x34] sm:$0xf] }
   0xa   :  { %136 = vmatpush.bf16.msra.mxu1 %v1092_v21  ;;  %107 = vmatpush.bf16.msra.mxu0 %v1088_v25  ;;  %v1113_v39 = vld [vmem:[%s1723_s1 + $0x38] sm:$0xf0] }
   0xb   :  { %8 = vsyncpa [#allocation3], 0  ;;  %v1407_v41 = vor.u32 %v1170_v36, %v1111_v35  ;;  %v1177_v42 = vld [vmem:[%s1722_s0] sm:$0xff]  ;;  %1186 = vset.pattern.permute.xlu2 %v1281_v40  ;;  %v1413_v43 = vor.u32 %v1169_v38, %v1113_v39  ;;  %vm88_vm0 = vcmask 392192   ;;  %v159_v44 = vlaneseq  ;;  %s1282_s1 = smov 64   ;;  %s1049_s13 = sshll.u32 %s1725_s3, 4  ;;  %s1050_s13 = int_to_ptr.hbm [resolvable:$true] %s1049_s13 }
   0xc   :  { %219 = vmatpush.bf16.msra.mxu2 %v1380_v29  ;;  %vm209_vm2 = vcmask 523264   ;;  %s1284_s14 = smov 128   ;;  %s1285_s15 = smov 8  }
   0xd   :  { %232 = vmatpush.bf16.msra.mxu3 %v1392_v33  ;;  %v1451_v45 = vand.u32 127, %v159_v44 }
   0xe   :  { %137 = vmatpush.bf16.msra.mxu1 %v1084_v34  ;;  %108 = vmatpush.bf16.msra.mxu0 %v1080_v37  ;;  %v1178_v34 = vld [vmem:[%s1722_s0 + $0x8] sm:$0xff] }
   0xf   :  { %v1454_v46 = vadd.s32 128, %v1451_v45  ;;  %vm168_vm3 = vcmp.lt.s32.totalorder %v1451_v45, 32 }
  0x10   :  { %220 = vmatpush.bf16.msra.mxu2 %v1407_v41 }
  0x11   :  { %1105 = vmatmul.msk.bf16.vlgmr.msra.gmra.mxu1 %vm88_vm0, %v1177_v42  ;;  %233 = vmatpush.bf16.msra.mxu3 %v1413_v43  ;;  %vm165_vm1 = vcmp.lt.s32.totalorder %v1454_v46, 192 }
  0x12   :  { %454 = vmatpush.bf16.msrb.mxu1 %v1326_v7  ;;  %441 = vmatpush.bf16.msrb.mxu0 %v1315_v3 }
  0x13   :  { %1101 = vmatmul.msk.bf16.vlgmr.msra.gmra.mxu0 %vm88_vm0, %v1177_v42  ;;  %221 = vmatmul.bf16.vlgmr.msra.gmra.mxu2 %v1281_v40 }
  0x14   :  { %273 = vmatpush.bf16.msrb.mxu2 %v1315_v3  ;;  %234 = vmatmul.bf16.vlgmr.msra.gmra.mxu3 %v1281_v40 }
  0x15   :  { %286 = vmatpush.bf16.msrb.mxu3 %v1326_v7 }
  0x16   :  { %455 = vmatpush.bf16.msrb.mxu1 %v1350_v17  ;;  %442 = vmatpush.bf16.msrb.mxu0 %v1348_v16 }
  0x18   :  { %274 = vmatpush.bf16.msrb.mxu2 %v1348_v16 }
  0x19   :  { %287 = vmatpush.bf16.msrb.mxu3 %v1350_v17 }
  0x1a   :  { %456 = vmatpush.bf16.msrb.mxu1 %v1392_v33  ;;  %443 = vmatpush.bf16.msrb.mxu0 %v1380_v29 }
  0x1c   :  { %275 = vmatpush.bf16.msrb.mxu2 %v1380_v29 }
  0x1d   :  { %288 = vmatpush.bf16.msrb.mxu3 %v1392_v33 }
  0x1e   :  { %457 = vmatpush.bf16.msrb.mxu1 %v1413_v43  ;;  %444 = vmatpush.bf16.msrb.mxu0 %v1407_v41 }
  0x20   :  { %276 = vmatpush.bf16.msrb.mxu2 %v1407_v41 }
  0x21   :  { %289 = vmatpush.bf16.msrb.mxu3 %v1413_v43  ;;  %1106 = vmatmul.msk.bf16.gmra.mxu1 %vm88_vm0, %v1178_v34 }
  0x22   :  { %566 = vmatpush.bf16.msra.mxu1 %v1326_v7  ;;  %553 = vmatpush.bf16.msra.mxu0 %v1315_v3 }
  0x23   :  { %1102 = vmatmul.msk.bf16.gmra.mxu0 %vm88_vm0, %v1178_v34 }
  0x24   :  { %329 = vmatpush.bf16.msra.mxu2 %v1315_v3 }
  0x25   :  { %342 = vmatpush.bf16.msra.mxu3 %v1326_v7 }
  0x26   :  { %567 = vmatpush.bf16.msra.mxu1 %v1350_v17  ;;  %554 = vmatpush.bf16.msra.mxu0 %v1348_v16 }
  0x28   :  { %330 = vmatpush.bf16.msra.mxu2 %v1348_v16 }
  0x29   :  { %343 = vmatpush.bf16.msra.mxu3 %v1350_v17 }
  0x2a   :  { %568 = vmatpush.bf16.msra.mxu1 %v1392_v33  ;;  %555 = vmatpush.bf16.msra.mxu0 %v1380_v29 }
  0x2c   :  { %331 = vmatpush.bf16.msra.mxu2 %v1380_v29 }
  0x2d   :  { %344 = vmatpush.bf16.msra.mxu3 %v1392_v33 }
  0x2e   :  { %569 = vmatpush.bf16.msra.mxu1 %v1413_v43  ;;  %556 = vmatpush.bf16.msra.mxu0 %v1407_v41 }
  0x30   :  { %332 = vmatpush.bf16.msra.mxu2 %v1407_v41 }
  0x31   :  { %345 = vmatpush.bf16.msra.mxu3 %v1413_v43 }
  0x8e   :  { %v139_v49 = vpop.f32.mrf.mxu1 }
  0x90   :  { %v110_v47 = vpop.f32.mrf.mxu0 }
  0x96   :  { %v222_v48 = vpop.f32.mrf.mxu2  ;;  %v141_v11 = vpop.f32.mrf.mxu1 }
  0x97   :  { %v239_v50 = vadd.f32 %v222_v48, %v110_v47  ;;  %v235_v51 = vpop.f32.mrf.mxu3 }
  0x98   :  { %v240_v52 = vadd.f32 %v235_v51, %v139_v49  ;;  %v112_v12 = vpop.f32.mrf.mxu0 }
  0x99   :  { %v241_v53 = vmul.f32 0.5, %v239_v50 }
  0x9a   :  { %v242_v54 = vmul.f32 0.5, %v240_v52 }
  0x9b   :  { %1189 = vtanh.f32 %v241_v53 }
  0x9c   :  { %v244_v55 = vsel %vm165_vm1, %v240_v52, %v242_v54 }
  0x9d   :  { %1191 = vtanh.f32 %v244_v55 }
  0x9e   :  { %v224_v56 = vpop.f32.mrf.mxu2  ;;  %v144_v44 = vpop.f32.mrf.mxu1 }
  0x9f   :  { %v237_v57 = vpop.f32.mrf.mxu3 }
  0xa0   :  { %v115_v47 = vpop.f32.mrf.mxu0 }
  0xa1   :  { %v1190_v58 = vpop.eup %1189 }
  0xa2   :  { %v247_v59 = vmul.f32 0.5, %v1190_v58 }
  0xa3   :  { %v1192_v60 = vpop.eup %1191 }
  0xa4   :  { %v248_v61 = vmul.f32 0.5, %v1192_v60  ;;  %v249_v62 = vadd.f32 0.5, %v247_v59 }
  0xa6   :  { %v250_v63 = vadd.f32 0.5, %v248_v61  ;;  %v253_v2 = vmul.f32 0.0, %v249_v62 }
  0xa8   :  { %v252_v0 = vsel %vm165_vm1, %v1192_v60, %v250_v63 }
  0xa9   :  { %v254_v1 = vmul.f32 %v252_v0, %v249_v62 }
  0xab   :  { %256 = vrot.lane.b32.xlu0 %v254_v1, %s1282_s1 }
 0x11d   :  { %v257_v4 = vpop.permute.xlu0 %256 }
 0x11e   :  { %v259_v5 = vadd.f32 %v257_v4, %v253_v2 }
 0x120   :  { %1193 = vtanh.f32 %v259_v5 }
 0x126   :  { %v1194_v6 = vpop.eup %1193 }
 0x127   :  { %v1462_v8 = vmul.f32 %v1194_v6, %v252_v0 }
 0x129   :  { %v262_v9 = vpack.c.bf16 %v1462_v8, %v1462_v8 }
 0x12b   :  { %264 = vrot.lane.b32.xlu0 %v262_v9, %s1282_s1 }
 0x19d   :  { %v265_v10 = vpop.permute.xlu0 %264 }
 0x19e   :  { %1141 = vmatmul.msk.bf16.vlgmr.msrb.gmra.mxu2 %vm209_vm2, %v265_v10  ;;  %1142 = vmatmul.msk.bf16.vlgmr.msrb.gmra.mxu3 %vm209_vm2, %v265_v10 }
 0x19f   :  { %398 = vmatpush.bf16.msrb.mxu3 %v1326_v7  ;;  %385 = vmatpush.bf16.msrb.mxu2 %v1315_v3 }
 0x1a3   :  { %399 = vmatpush.bf16.msrb.mxu3 %v1350_v17  ;;  %386 = vmatpush.bf16.msrb.mxu2 %v1348_v16 }
 0x1a7   :  { %400 = vmatpush.bf16.msrb.mxu3 %v1392_v33  ;;  %387 = vmatpush.bf16.msrb.mxu2 %v1380_v29 }
 0x1ab   :  { %401 = vmatpush.bf16.msrb.mxu3 %v1413_v43  ;;  %388 = vmatpush.bf16.msrb.mxu2 %v1407_v41 }
 0x221   :  { %v278_v13 = vpop.f32.mrf.mxu2  ;;  %v291_v14 = vpop.f32.mrf.mxu3 }
 0x222   :  { %v295_v15 = vadd.f32 %v278_v13, %v112_v12  ;;  %v296_v18 = vadd.f32 %v291_v14, %v141_v11  ;;  %v146_v11 = vpop.f32.mrf.mxu1  ;;  %v117_v12 = vpop.f32.mrf.mxu0 }
 0x224   :  { %v297_v19 = vmul.f32 0.5, %v295_v15  ;;  %v298_v20 = vmul.f32 0.5, %v296_v18 }
 0x226   :  { %1195 = vtanh.f32 %v297_v19  ;;  %v300_v21 = vsel %vm165_vm1, %v296_v18, %v298_v20 }
 0x227   :  { %1197 = vtanh.f32 %v300_v21 }
 0x229   :  { %v280_v22 = vpop.f32.mrf.mxu2  ;;  %v293_v23 = vpop.f32.mrf.mxu3 }
 0x22c   :  { %v1196_v24 = vpop.eup %1195 }
 0x22d   :  { %v1198_v25 = vpop.eup %1197  ;;  %v303_v26 = vmul.f32 0.5, %v1196_v24  ;;  %v1179_v24 = vld [vmem:[%s1722_s0 + $0x10] sm:$0xff] }
 0x22e   :  { %v304_v27 = vmul.f32 0.5, %v1198_v25  ;;  %1107 = vmatmul.msk.bf16.gmra.mxu1 %vm88_vm0, %v1179_v24  ;;  %1103 = vmatmul.msk.bf16.gmra.mxu0 %vm88_vm0, %v1179_v24 }
 0x22f   :  { %v305_v30 = vadd.f32 0.5, %v303_v26 }
 0x230   :  { %v306_v28 = vadd.f32 0.5, %v304_v27 }
 0x231   :  { %v309_v35 = vmul.f32 %v305_v30, %v259_v5 }
 0x232   :  { %v308_v31 = vsel %vm165_vm1, %v1198_v25, %v306_v28  ;;  %v1180_v25 = vld [vmem:[%s1722_s0 + $0x18] sm:$0xff] }
 0x233   :  { %v310_v32 = vmul.f32 %v308_v31, %v305_v30 }
 0x235   :  { %312 = vrot.lane.b32.xlu1 %v310_v32, %s1282_s1 }
 0x23e   :  { %1108 = vmatmul.msk.bf16.gmra.mxu1 %vm88_vm0, %v1180_v25  ;;  %1104 = vmatmul.msk.bf16.gmra.mxu0 %vm88_vm0, %v1180_v25 }
 0x2a7   :  { %v313_v36 = vpop.permute.xlu1 %312 }
 0x2a8   :  { %v315_v37 = vadd.f32 %v313_v36, %v309_v35 }
 0x2aa   :  { %1199 = vtanh.f32 %v315_v37 }
 0x2ab   :  { %v149_v35 = vpop.f32.mrf.mxu1  ;;  %v120_v36 = vpop.f32.mrf.mxu0 }
 0x2b0   :  { %v1200_v38 = vpop.eup %1199 }
 0x2b1   :  { %v1487_v39 = vmul.f32 %v1200_v38, %v308_v31 }
 0x2b3   :  { %v318_v40 = vpack.c.bf16 %v1487_v39, %v1487_v39  ;;  %v122_v38 = vpop.f32.mrf.mxu0 }
 0x2b5   :  { %320 = vrot.lane.b32.xlu1 %v318_v40, %s1282_s1 }
 0x327   :  { %v321_v42 = vpop.permute.xlu1 %320 }
 0x328   :  { %1143 = vmatmul.msk.bf16.vlgmr.msra.gmra.mxu2 %vm209_vm2, %v321_v42  ;;  %1144 = vmatmul.msk.bf16.vlgmr.msra.gmra.mxu3 %vm209_vm2, %v321_v42  ;;  %v1546_v42 = vpop.f32.mrf.mxu0 }
 0x329   :  { %510 = vmatpush.bf16.msra.mxu3 %v1326_v7  ;;  %497 = vmatpush.bf16.msra.mxu2 %v1315_v3 }
 0x32d   :  { %511 = vmatpush.bf16.msra.mxu3 %v1350_v17  ;;  %498 = vmatpush.bf16.msra.mxu2 %v1348_v16 }
 0x331   :  { %512 = vmatpush.bf16.msra.mxu3 %v1392_v33  ;;  %499 = vmatpush.bf16.msra.mxu2 %v1380_v29 }
 0x335   :  { %513 = vmatpush.bf16.msra.mxu3 %v1413_v43  ;;  %500 = vmatpush.bf16.msra.mxu2 %v1407_v41 }
 0x3ab   :  { %v334_v48 = vpop.f32.mrf.mxu2  ;;  %v347_v49 = vpop.f32.mrf.mxu3 }
 0x3ac   :  { %v351_v50 = vadd.f32 %v334_v48, %v115_v47  ;;  %v352_v51 = vadd.f32 %v347_v49, %v144_v44  ;;  %v1550_v47 = vpop.f32.mrf.mxu0 }
 0x3ae   :  { %v353_v52 = vmul.f32 0.5, %v351_v50  ;;  %v354_v53 = vmul.f32 0.5, %v352_v51 }
 0x3b0   :  { %1201 = vtanh.f32 %v353_v52  ;;  %v356_v54 = vsel %vm165_vm1, %v352_v51, %v354_v53 }
 0x3b1   :  { %1203 = vtanh.f32 %v356_v54 }
 0x3b3   :  { %v336_v55 = vpop.f32.mrf.mxu2  ;;  %v349_v56 = vpop.f32.mrf.mxu3 }
 0x3b6   :  { %v1202_v57 = vpop.eup %1201 }
 0x3b7   :  { %v1204_v58 = vpop.eup %1203  ;;  %v359_v59 = vmul.f32 0.5, %v1202_v57 }
 0x3b8   :  { %v360_v60 = vmul.f32 0.5, %v1204_v58 }
 0x3b9   :  { %v361_v62 = vadd.f32 0.5, %v359_v59 }
 0x3ba   :  { %v362_v61 = vadd.f32 0.5, %v360_v60 }
 0x3bb   :  { %v365_v1 = vmul.f32 %v361_v62, %v315_v37  ;;  %v151_v37 = vpop.f32.mrf.mxu1 }
 0x3bc   :  { %v364_v63 = vsel %vm165_vm1, %v1204_v58, %v362_v61 }
 0x3bd   :  { %v366_v0 = vmul.f32 %v364_v63, %v361_v62 }
 0x3bf   :  { %368 = vrot.lane.b32.xlu2 %v366_v0, %s1282_s1 }
 0x3c3   :  { %v1544_v40 = vpop.f32.mrf.mxu1 }
 0x3cb   :  { %v1548_v44 = vpop.f32.mrf.mxu1 }
 0x419   :  { %v369_v2 = vpop.permute.xlu2 %368 }
 0x41a   :  { %v371_v4 = vadd.f32 %v369_v2, %v365_v1 }
 0x41c   :  { %1205 = vtanh.f32 %v371_v4 }
 0x422   :  { %v1206_v5 = vpop.eup %1205 }
 0x423   :  { %v1507_v6 = vmul.f32 %v1206_v5, %v364_v63 }
 0x425   :  { %v374_v9 = vpack.c.bf16 %v1507_v6, %v1507_v6 }
 0x427   :  { %376 = vrot.lane.b32.xlu2 %v374_v9, %s1282_s1 }
 0x481   :  { %v377_v10 = vpop.permute.xlu2 %376 }
 0x482   :  { %1145 = vmatmul.msk.bf16.vlgmr.msrb.gmra.mxu2 %vm209_vm2, %v377_v10  ;;  %1146 = vmatmul.msk.bf16.vlgmr.msrb.gmra.mxu3 %vm209_vm2, %v377_v10 }
 0x483   :  { %622 = vmatpush.bf16.msrb.mxu3 %v1326_v7  ;;  %609 = vmatpush.bf16.msrb.mxu2 %v1315_v3 }
 0x487   :  { %623 = vmatpush.bf16.msrb.mxu3 %v1350_v17  ;;  %610 = vmatpush.bf16.msrb.mxu2 %v1348_v16 }
 0x48b   :  { %624 = vmatpush.bf16.msrb.mxu3 %v1392_v33  ;;  %611 = vmatpush.bf16.msrb.mxu2 %v1380_v29 }
 0x48f   :  { %625 = vmatpush.bf16.msrb.mxu3 %v1413_v43  ;;  %612 = vmatpush.bf16.msrb.mxu2 %v1407_v41 }
 0x505   :  { %v390_v13 = vpop.f32.mrf.mxu2  ;;  %v403_v14 = vpop.f32.mrf.mxu3 }
 0x506   :  { %v407_v15 = vadd.f32 %v390_v13, %v117_v12  ;;  %v408_v7 = vadd.f32 %v403_v14, %v146_v11 }
 0x508   :  { %v409_v18 = vmul.f32 0.5, %v407_v15  ;;  %v410_v3 = vmul.f32 0.5, %v408_v7 }
 0x50a   :  { %1207 = vtanh.f32 %v409_v18  ;;  %v412_v16 = vsel %vm165_vm1, %v408_v7, %v410_v3 }
 0x50b   :  { %1209 = vtanh.f32 %v412_v16 }
 0x50d   :  { %v392_v17 = vpop.f32.mrf.mxu2  ;;  %v405_v33 = vpop.f32.mrf.mxu3 }
 0x510   :  { %v1208_v29 = vpop.eup %1207 }
 0x511   :  { %v1210_v19 = vpop.eup %1209  ;;  %v415_v43 = vmul.f32 0.5, %v1208_v29 }
 0x512   :  { %v416_v20 = vmul.f32 0.5, %v1210_v19 }
 0x513   :  { %v417_v21 = vadd.f32 0.5, %v415_v43 }
 0x514   :  { %v418_v41 = vadd.f32 0.5, %v416_v20 }
 0x515   :  { %v421_v26 = vmul.f32 %v417_v21, %v371_v4 }
 0x516   :  { %v420_v22 = vsel %vm165_vm1, %v1210_v19, %v418_v41 }
 0x517   :  { %v422_v23 = vmul.f32 %v420_v22, %v417_v21 }
 0x519   :  { %424 = vrot.lane.b32.xlu0 %v422_v23, %s1282_s1 }
 0x58b   :  { %v425_v27 = vpop.permute.xlu0 %424 }
 0x58c   :  { %v427_v28 = vadd.f32 %v425_v27, %v421_v26 }
 0x58e   :  { %1211 = vtanh.f32 %v427_v28 }
 0x594   :  { %v1212_v30 = vpop.eup %1211 }
 0x595   :  { %v1537_v31 = vmul.f32 %v1212_v30, %v420_v22 }
 0x597   :  { %v430_v32 = vpack.c.bf16 %v1537_v31, %v1537_v31 }
 0x599   :  { %432 = vrot.lane.b32.xlu1 %v430_v32, %s1282_s1 }
 0x60b   :  { %v433_v34 = vpop.permute.xlu1 %432 }
 0x60c   :  { %1147 = vmatmul.msk.bf16.vlgmr.msrb.gmra.mxu0 %vm209_vm2, %v433_v34  ;;  %1148 = vmatmul.msk.bf16.vlgmr.msrb.gmra.mxu1 %vm209_vm2, %v433_v34 }
 0x689   :  { %v446_v48 = vpop.f32.mrf.mxu0  ;;  %v459_v49 = vpop.f32.mrf.mxu1 }
 0x68a   :  { %v463_v50 = vadd.f32 %v446_v48, %v120_v36  ;;  %v464_v51 = vadd.f32 %v459_v49, %v149_v35 }
 0x68c   :  { %v465_v52 = vmul.f32 0.5, %v463_v50  ;;  %v466_v53 = vmul.f32 0.5, %v464_v51 }
 0x68e   :  { %1213 = vtanh.f32 %v465_v52  ;;  %v468_v54 = vsel %vm165_vm1, %v464_v51, %v466_v53 }
 0x68f   :  { %1215 = vtanh.f32 %v468_v54 }
 0x691   :  { %v448_v55 = vpop.f32.mrf.mxu0  ;;  %v461_v56 = vpop.f32.mrf.mxu1 }
 0x694   :  { %v1214_v57 = vpop.eup %1213 }
 0x695   :  { %v1216_v58 = vpop.eup %1215  ;;  %v471_v59 = vmul.f32 0.5, %v1214_v57 }
 0x696   :  { %v472_v60 = vmul.f32 0.5, %v1216_v58 }
 0x697   :  { %v473_v62 = vadd.f32 0.5, %v471_v59 }
 0x698   :  { %v474_v61 = vadd.f32 0.5, %v472_v60 }
 0x699   :  { %v477_v1 = vmul.f32 %v473_v62, %v427_v28 }
 0x69a   :  { %v476_v63 = vsel %vm165_vm1, %v1216_v58, %v474_v61 }
 0x69b   :  { %v478_v0 = vmul.f32 %v476_v63, %v473_v62 }
 0x69d   :  { %480 = vrot.lane.b32.xlu2 %v478_v0, %s1282_s1  ;;  %v699_v0 = vld [vmem:[%s1724_s2 + $0x28] sm:$0xff] }
 0x6f7   :  { %v481_v2 = vpop.permute.xlu2 %480 }
 0x6f8   :  { %v483_v4 = vadd.f32 %v481_v2, %v477_v1  ;;  %v697_v1 = vld [vmem:[%s1724_s2 + $0x18] sm:$0xff]  ;;  %v696_v2 = vld [vmem:[%s1724_s2 + $0x10] sm:$0xff] }
 0x6fa   :  { %1217 = vtanh.f32 %v483_v4 }
 0x700   :  { %v1218_v5 = vpop.eup %1217 }
 0x701   :  { %v1557_v9 = vmul.f32 %v1218_v5, %v476_v63  ;;  %v700_v63 = vld [vmem:[%s1724_s2 + $0x30] sm:$0xff]  ;;  %v694_v5 = vld [vmem:[%s1724_s2] sm:$0xff] }
 0x703   :  { %v486_v10 = vpack.c.bf16 %v1557_v9, %v1557_v9 }
 0x705   :  { %488 = vrot.lane.b32.xlu0 %v486_v10, %s1282_s1 }
 0x777   :  { %v489_v11 = vpop.permute.xlu0 %488 }
 0x778   :  { %1149 = vmatmul.msk.bf16.vlgmr.msra.gmra.mxu2 %vm209_vm2, %v489_v11  ;;  %1150 = vmatmul.msk.bf16.vlgmr.msra.gmra.mxu3 %vm209_vm2, %v489_v11 }
 0x7fb   :  { %v502_v12 = vpop.f32.mrf.mxu2  ;;  %v515_v13 = vpop.f32.mrf.mxu3 }
 0x7fc   :  { %v519_v14 = vadd.f32 %v502_v12, %v122_v38  ;;  %v520_v15 = vadd.f32 %v515_v13, %v151_v37 }
 0x7fe   :  { %v521_v7 = vmul.f32 0.5, %v519_v14  ;;  %v522_v18 = vmul.f32 0.5, %v520_v15 }
 0x800   :  { %1219 = vtanh.f32 %v521_v7  ;;  %v524_v3 = vsel %vm165_vm1, %v520_v15, %v522_v18 }
 0x801   :  { %1221 = vtanh.f32 %v524_v3 }
 0x803   :  { %v504_v16 = vpop.f32.mrf.mxu2  ;;  %v517_v17 = vpop.f32.mrf.mxu3 }
 0x806   :  { %v1220_v33 = vpop.eup %1219 }
 0x807   :  { %v1222_v29 = vpop.eup %1221  ;;  %v527_v19 = vmul.f32 0.5, %v1220_v33 }
 0x808   :  { %v528_v43 = vmul.f32 0.5, %v1222_v29 }
 0x809   :  { %v529_v41 = vadd.f32 0.5, %v527_v19 }
 0x80a   :  { %v530_v20 = vadd.f32 0.5, %v528_v43 }
 0x80b   :  { %v533_v23 = vmul.f32 %v529_v41, %v483_v4  ;;  %v695_v4 = vld [vmem:[%s1724_s2 + $0x8] sm:$0xff] }
 0x80c   :  { %v532_v21 = vsel %vm165_vm1, %v1222_v29, %v530_v20 }
 0x80d   :  { %v534_v22 = vmul.f32 %v532_v21, %v529_v41 }
 0x80f   :  { %536 = vrot.lane.b32.xlu1 %v534_v22, %s1282_s1 }
 0x881   :  { %v537_v24 = vpop.permute.xlu1 %536 }
 0x882   :  { %v539_v25 = vadd.f32 %v537_v24, %v533_v23 }
 0x884   :  { %1223 = vtanh.f32 %v539_v25 }
 0x88a   :  { %v1224_v26 = vpop.eup %1223 }
 0x88b   :  { %v541_v27 = vmul.f32 %v1224_v26, %v532_v21 }
 0x88d   :  { %v542_v28 = vpack.c.bf16 %v541_v27, %v541_v27 }
 0x88f   :  { %544 = vrot.lane.b32.xlu2 %v542_v28, %s1282_s1 }
 0x8e9   :  { %v545_v30 = vpop.permute.xlu2 %544 }
 0x8ea   :  { %1151 = vmatmul.msk.bf16.vlgmr.msra.gmra.mxu0 %vm209_vm2, %v545_v30  ;;  %1152 = vmatmul.msk.bf16.vlgmr.msra.gmra.mxu1 %vm209_vm2, %v545_v30 }
 0x967   :  { %v558_v32 = vpop.f32.mrf.mxu0  ;;  %v571_v34 = vpop.f32.mrf.mxu1 }
 0x968   :  { %v575_v35 = vadd.f32 %v558_v32, %v1546_v42  ;;  %v576_v36 = vadd.f32 %v571_v34, %v1544_v40 }
 0x96a   :  { %v577_v37 = vmul.f32 0.5, %v575_v35  ;;  %v578_v38 = vmul.f32 0.5, %v576_v36 }
 0x96c   :  { %1225 = vtanh.f32 %v577_v37  ;;  %v580_v48 = vsel %vm165_vm1, %v576_v36, %v578_v38 }
 0x96d   :  { %1227 = vtanh.f32 %v580_v48 }
 0x96f   :  { %v560_v49 = vpop.f32.mrf.mxu0  ;;  %v573_v50 = vpop.f32.mrf.mxu1 }
 0x972   :  { %v1226_v51 = vpop.eup %1225 }
 0x973   :  { %v1228_v52 = vpop.eup %1227  ;;  %v583_v53 = vmul.f32 0.5, %v1226_v51 }
 0x974   :  { %v584_v54 = vmul.f32 0.5, %v1228_v52 }
 0x975   :  { %v585_v56 = vadd.f32 0.5, %v583_v53 }
 0x976   :  { %v586_v55 = vadd.f32 0.5, %v584_v54 }
 0x977   :  { %v589_v40 = vmul.f32 %v585_v56, %v539_v25 }
 0x978   :  { %v588_v42 = vsel %vm165_vm1, %v1228_v52, %v586_v55 }
 0x979   :  { %v590_v57 = vmul.f32 %v588_v42, %v585_v56 }
 0x97b   :  { %592 = vrot.lane.b32.xlu0 %v590_v57, %s1282_s1 }
 0x983   :  { %673 = vrot.lane.b32.xlu0 %v1507_v6, %s1282_s1  ;;  %v701_v6 = vld [vmem:[%s1724_s2 + $0x38] sm:$0xff] }
 0x984   :  { %759 = vmatpush.msra.mxu2 %v701_v6  ;;  %782 = vmatpush.msra.mxu3 %v701_v6 }
 0x985   :  { %713 = vmatpush.msrb.mxu0 %v701_v6  ;;  %736 = vmatpush.msrb.mxu1 %v701_v6 }
 0x986   :  { %760 = vmatpush.msra.mxu2 %v700_v63  ;;  %783 = vmatpush.msra.mxu3 %v700_v63 }
 0x987   :  { %714 = vmatpush.msrb.mxu0 %v700_v63  ;;  %737 = vmatpush.msrb.mxu1 %v700_v63 }
 0x988   :  { %761 = vmatpush.msra.mxu2 %v699_v0  ;;  %784 = vmatpush.msra.mxu3 %v699_v0 }
 0x989   :  { %715 = vmatpush.msrb.mxu0 %v699_v0  ;;  %738 = vmatpush.msrb.mxu1 %v699_v0 }
 0x9ed   :  { %v593_v58 = vpop.permute.xlu0 %592 }
 0x9ee   :  { %v1581_v59 = vadd.f32 %v593_v58, %v589_v40 }
 0x9f0   :  { %1229 = vtanh.f32 %v1581_v59 }
 0x9f5   :  { %v674_v11 = vpop.permute.xlu0 %673 }
 0x9f6   :  { %v1230_v60 = vpop.eup %1229 }
 0x9f7   :  { %v597_v61 = vmul.f32 %v1230_v60, %v588_v42 }
 0x9f9   :  { %v598_v62 = vpack.c.bf16 %v597_v61, %v597_v61 }
 0x9fb   :  { %600 = vrot.lane.b32.xlu1 %v598_v62, %s1282_s1 }
 0xa03   :  { %677 = vrot.lane.b32.xlu1 %v541_v27, %s1282_s1 }
 0xa0b   :  { %682 = vrot.lane.b32.xlu1 %v1537_v31, %s1282_s1  ;;  %v698_v31 = vld [vmem:[%s1724_s2 + $0x20] sm:$0xff]  ;;  %s1283_s2 = smov [#allocation2]  }
 0xa0c   :  { %762 = vmatpush.msra.mxu2 %v698_v31  ;;  %785 = vmatpush.msra.mxu3 %v698_v31  ;;  %s1047_s10 = sshll.u32 %s1283_s2, 4  ;;  %s1048_s10 = int_to_ptr.vmem [resolvable:$true] %s1047_s10 }
 0xa0d   :  { %716 = vmatpush.msrb.mxu0 %v698_v31  ;;  %739 = vmatpush.msrb.mxu1 %v698_v31 }
 0xa0e   :  { %763 = vmatpush.msra.mxu2 %v697_v1  ;;  %786 = vmatpush.msra.mxu3 %v697_v1 }
 0xa0f   :  { %717 = vmatpush.msrb.mxu0 %v697_v1  ;;  %740 = vmatpush.msrb.mxu1 %v697_v1 }
 0xa10   :  { %764 = vmatpush.msra.mxu2 %v696_v2  ;;  %787 = vmatpush.msra.mxu3 %v696_v2 }
 0xa11   :  { %718 = vmatpush.msrb.mxu0 %v696_v2  ;;  %741 = vmatpush.msrb.mxu1 %v696_v2 }
 0xa12   :  { %765 = vmatpush.msra.mxu2 %v695_v4  ;;  %788 = vmatpush.msra.mxu3 %v695_v4 }
 0xa13   :  { %668 = vrot.lane.b32.xlu1 %v597_v61, %s1282_s1  ;;  %719 = vmatpush.msrb.mxu0 %v695_v4 }
 0xa14   :  { %742 = vmatpush.msrb.mxu1 %v695_v4  ;;  %766 = vmatpush.msra.mxu2 %v694_v5 }
 0xa15   :  { %789 = vmatpush.msra.mxu3 %v694_v5  ;;  %720 = vmatpush.msrb.mxu0 %v694_v5 }
 0xa16   :  { %743 = vmatpush.msrb.mxu1 %v694_v5 }
 0xa17   :  { %805 = vmatpush.msra.mxu0 %v701_v6 }
 0xa18   :  { %828 = vmatpush.msra.mxu1 %v701_v6 }
 0xa19   :  { %806 = vmatpush.msra.mxu0 %v700_v63 }
 0xa1a   :  { %829 = vmatpush.msra.mxu1 %v700_v63 }
 0xa1b   :  { %807 = vmatpush.msra.mxu0 %v699_v0 }
 0xa1c   :  { %830 = vmatpush.msra.mxu1 %v699_v0 }
 0xa1d   :  { %808 = vmatpush.msra.mxu0 %v698_v31 }
 0xa1e   :  { %831 = vmatpush.msra.mxu1 %v698_v31 }
 0xa1f   :  { %809 = vmatpush.msra.mxu0 %v697_v1 }
 0xa20   :  { %832 = vmatpush.msra.mxu1 %v697_v1 }
 0xa21   :  { %810 = vmatpush.msra.mxu0 %v696_v2 }
 0xa22   :  { %833 = vmatpush.msra.mxu1 %v696_v2 }
 0xa23   :  { %811 = vmatpush.msra.mxu0 %v695_v4 }
 0xa24   :  { %834 = vmatpush.msra.mxu1 %v695_v4 }
 0xa25   :  { %812 = vmatpush.msra.mxu0 %v694_v5 }
 0xa26   :  { %835 = vmatpush.msra.mxu1 %v694_v5 }
 0xa6d   :  { %v601_v10 = vpop.permute.xlu1 %600 }
 0xa6e   :  { %1153 = vmatmul.msk.bf16.vlgmr.msrb.gmra.mxu2 %vm209_vm2, %v601_v10  ;;  %1154 = vmatmul.msk.bf16.vlgmr.msrb.gmra.mxu3 %vm209_vm2, %v601_v10 }
 0xa6f   :  { %874 = vmatpush.msrb.mxu3 %v701_v6  ;;  %851 = vmatpush.msrb.mxu2 %v701_v6 }
 0xa71   :  { %875 = vmatpush.msrb.mxu3 %v700_v63  ;;  %852 = vmatpush.msrb.mxu2 %v700_v63 }
 0xa73   :  { %876 = vmatpush.msrb.mxu3 %v699_v0  ;;  %853 = vmatpush.msrb.mxu2 %v699_v0 }
 0xa75   :  { %v678_v12 = vpop.permute.xlu1 %677  ;;  %877 = vmatpush.msrb.mxu3 %v698_v31  ;;  %854 = vmatpush.msrb.mxu2 %v698_v31 }
 0xa76   :  { %v1618_v13 = vsel %vm168_vm3, %v674_v11, %v678_v12  ;;  %v1622_v14 = vsel %vm168_vm3, %v678_v12, %v674_v11 }
 0xa77   :  { %1006 = vst.msk [vmem:[#allocation2 + $0x10] sm:$0xff] %vm209_vm2, %v1618_v13  ;;  %878 = vmatpush.msrb.mxu3 %v697_v1  ;;  %855 = vmatpush.msrb.mxu2 %v697_v1 }
 0xa78   :  { %1012 = vst.msk [vmem:[#allocation2 + $0x28] sm:$0xff] %vm209_vm2, %v1622_v14 }
 0xa79   :  { %879 = vmatpush.msrb.mxu3 %v696_v2  ;;  %856 = vmatpush.msrb.mxu2 %v696_v2 }
 0xa7b   :  { %880 = vmatpush.msrb.mxu3 %v695_v4  ;;  %857 = vmatpush.msrb.mxu2 %v695_v4 }
 0xa7d   :  { %881 = vmatpush.msrb.mxu3 %v694_v5  ;;  %858 = vmatpush.msrb.mxu2 %v694_v5  ;;  %v683_v30 = vpop.permute.xlu1 %682 }
 0xa7e   :  { %1157 = vmatmul.msk.f32.vlgmr.msra.gmra.mxu2 %vm209_vm2, %v1618_v13 }
 0xaf1   :  { %v614_v15 = vpop.f32.mrf.mxu2  ;;  %v627_v7 = vpop.f32.mrf.mxu3 }
 0xaf2   :  { %v631_v18 = vadd.f32 %v614_v15, %v1550_v47  ;;  %v632_v3 = vadd.f32 %v627_v7, %v1548_v44 }
 0xaf4   :  { %v633_v16 = vmul.f32 0.5, %v631_v18  ;;  %v634_v17 = vmul.f32 0.5, %v632_v3 }
 0xaf6   :  { %1231 = vtanh.f32 %v633_v16  ;;  %v636_v33 = vsel %vm165_vm1, %v632_v3, %v634_v17 }
 0xaf7   :  { %1233 = vtanh.f32 %v636_v33 }
 0xaf9   :  { %v616_v29 = vpop.f32.mrf.mxu2  ;;  %v629_v19 = vpop.f32.mrf.mxu3 }
 0xafc   :  { %v1232_v43 = vpop.eup %1231 }
 0xafd   :  { %v1234_v20 = vpop.eup %1233  ;;  %v639_v41 = vmul.f32 0.5, %v1232_v43 }
 0xafe   :  { %v640_v21 = vmul.f32 0.5, %v1234_v20 }
 0xaff   :  { %v641_v23 = vadd.f32 0.5, %v639_v41 }
 0xb00   :  { %v642_v22 = vadd.f32 0.5, %v640_v21 }
 0xb01   :  { %v645_v44 = vmul.f32 %v641_v23, %v1581_v59  ;;  %v768_v51 = vpop.f32.mrf.mxu2 }
 0xb02   :  { %v644_v47 = vsel %vm165_vm1, %v1234_v20, %v642_v22 }
 0xb03   :  { %v646_v24 = vmul.f32 %v644_v47, %v641_v23 }
 0xb05   :  { %648 = vrot.lane.b32.xlu2 %v646_v24, %s1282_s1 }
 0xb0d   :  { %655 = vrot.lane.b32.xlu2 %v1462_v8, %s1282_s1 }
 0xb15   :  { %686 = vrot.lane.b32.xlu2 %v1557_v9, %s1282_s1 }
 0xb5f   :  { %v649_v25 = vpop.permute.xlu2 %648 }
 0xb60   :  { %v1642_v26 = vadd.f32 %v649_v25, %v645_v44 }
 0xb62   :  { %1235 = vtanh.f32 %v1642_v26 }
 0xb67   :  { %v656_v27 = vpop.permute.xlu2 %655 }
 0xb68   :  { %v1236_v28 = vpop.eup %1235 }
 0xb69   :  { %v653_v46 = vmul.f32 %v1236_v28, %v644_v47 }
 0xb6b   :  { %659 = vrot.lane.b32.xlu0 %v653_v46, %s1282_s1 }
 0xb6f   :  { %v687_v32 = vpop.permute.xlu2 %686 }
 0xb70   :  { %v1648_v8 = vsel %vm168_vm3, %v683_v30, %v687_v32  ;;  %v1652_v9 = vsel %vm168_vm3, %v687_v32, %v683_v30 }
 0xb71   :  { %1008 = vst.msk [vmem:[#allocation2 + $0x18] sm:$0xff] %vm209_vm2, %v1648_v8  ;;  %1158 = vmatmul.msk.f32.vlgmr.msra.gmra.mxu3 %vm209_vm2, %v1648_v8 }
 0xb72   :  { %1010 = vst.msk [vmem:[#allocation2 + $0x20] sm:$0xff] %vm209_vm2, %v1652_v9 }
 0xb73   :  { %664 = vrot.lane.b32.xlu0 %v1487_v39, %s1282_s1  ;;  %v669_v39 = vpop.permute.xlu1 %668 }
 0xbdd   :  { %v660_v34 = vpop.permute.xlu0 %659 }
 0xbde   :  { %v1664_v35 = vsel %vm168_vm3, %v656_v27, %v660_v34  ;;  %v1668_v36 = vsel %vm168_vm3, %v660_v34, %v656_v27  ;;  %1020 = vst.msk [vmem:[#allocation2 + $0x48] sm:$0xff] %vm209_vm2, %v660_v34 }
 0xbdf   :  { %1002 = vst.msk [vmem:[#allocation2] sm:$0xff] %vm209_vm2, %v1664_v35  ;;  %1155 = vmatmul.msk.f32.vlgmr.msrb.gmra.mxu0 %vm209_vm2, %v1664_v35  ;;  %1162 = vmatmul.msk.f32.vlgmr.msrb.gmra.mxu3 %vm209_vm2, %v1668_v36 }
 0xbe0   :  { %1016 = vst.msk [vmem:[#allocation2 + $0x38] sm:$0xff] %vm209_vm2, %v1668_v36 }
 0xbe5   :  { %v665_v37 = vpop.permute.xlu0 %664 }
 0xbe6   :  { %v1681_v38 = vsel %vm168_vm3, %v665_v37, %v669_v39  ;;  %v1685_v48 = vsel %vm168_vm3, %v669_v39, %v665_v37 }
 0xbe7   :  { %1004 = vst.msk [vmem:[#allocation2 + $0x8] sm:$0xff] %vm209_vm2, %v1681_v38  ;;  %1156 = vmatmul.msk.f32.vlgmr.msrb.gmra.mxu1 %vm209_vm2, %v1681_v38  ;;  %1159 = vmatmul.msk.f32.vlgmr.msra.gmra.mxu0 %vm209_vm2, %v1652_v9 }
 0xbe8   :  { %1014 = vst.msk [vmem:[#allocation2 + $0x30] sm:$0xff] %vm209_vm2, %v1685_v48  ;;  %1161 = vmatmul.msk.f32.vlgmr.msrb.gmra.mxu2 %vm209_vm2, %v1685_v48 }
 0xbef   :  { %1160 = vmatmul.msk.f32.vlgmr.msra.gmra.mxu1 %vm209_vm2, %v1622_v14 }
 0xbf4   :  { %v791_v53 = vpop.f32.mrf.mxu3 }
 0xc5c   :  { %v722_v45 = vpop.f32.mrf.mxu0 }
 0xc62   :  { %v883_v59 = vpop.f32.mrf.mxu3 }
 0xc64   :  { %v745_v49 = vpop.f32.mrf.mxu1  ;;  %v814_v55 = vpop.f32.mrf.mxu0 }
 0xc65   :  { %v886_v50 = vmax.f32 %v722_v45, %v745_v49 }
 0xc67   :  { %v887_v52 = vmax.f32 %v886_v50, %v768_v51 }
 0xc69   :  { %v888_v54 = vmax.f32 %v887_v52, %v791_v53 }
 0xc6b   :  { %v889_v56 = vmax.f32 %v888_v54, %v814_v55  ;;  %v860_v40 = vpop.f32.mrf.mxu2 }
 0xc6c   :  { %v837_v42 = vpop.f32.mrf.mxu1 }
 0xc6d   :  { %v890_v57 = vmax.f32 %v889_v56, %v837_v42 }
 0xc6f   :  { %v891_v58 = vmax.f32 %v890_v57, %v860_v40 }
 0xc71   :  { %v892_v60 = vmax.f32 %v891_v58, %v883_v59 }
 0xc73   :  { %v893_v61 = vsub.f32 %v722_v45, %v892_v60  ;;  %v896_v62 = vsub.f32 %v745_v49, %v892_v60  ;;  %v899_v6 = vsub.f32 %v768_v51, %v892_v60  ;;  %v902_v63 = vsub.f32 %v791_v53, %v892_v60 }
 0xc74   :  { %v905_v2 = vsub.f32 %v814_v55, %v892_v60  ;;  %v908_v5 = vsub.f32 %v837_v42, %v892_v60  ;;  %v911_v11 = vsub.f32 %v860_v40, %v892_v60  ;;  %v914_v15 = vsub.f32 %v883_v59, %v892_v60 }
 0xc75   :  { %v894_v0 = vmul.f32 1.442695, %v893_v61  ;;  %v897_v31 = vmul.f32 1.442695, %v896_v62  ;;  %v900_v1 = vmul.f32 1.442695, %v899_v6 }
 0xc76   :  { %v903_v4 = vmul.f32 1.442695, %v902_v63  ;;  %v906_v10 = vmul.f32 1.442695, %v905_v2  ;;  %v909_v12 = vmul.f32 1.442695, %v908_v5 }
 0xc77   :  { %1237 = vpow2.f32 %v894_v0  ;;  %v912_v3 = vmul.f32 1.442695, %v911_v11  ;;  %v915_v33 = vmul.f32 1.442695, %v914_v15 }
 0xc78   :  { %1239 = vpow2.f32 %v897_v31 }
 0xc79   :  { %1241 = vpow2.f32 %v900_v1 }
 0xc7a   :  { %1243 = vpow2.f32 %v903_v4 }
 0xc7b   :  { %1245 = vpow2.f32 %v906_v10 }
 0xc7c   :  { %1247 = vpow2.f32 %v909_v12 }
 0xc7d   :  { %v1238_v7 = vpop.eup %1237  ;;  %1249 = vpow2.f32 %v912_v3 }
 0xc7e   :  { %v1240_v18 = vpop.eup %1239  ;;  %1251 = vpow2.f32 %v915_v33 }
 0xc7f   :  { %v917_v16 = vadd.f32 %v1240_v18, %v1238_v7  ;;  %v1242_v17 = vpop.eup %1241 }
 0xc80   :  { %v1244_v19 = vpop.eup %1243 }
 0xc81   :  { %v918_v29 = vadd.f32 %v1242_v17, %v917_v16  ;;  %v1246_v20 = vpop.eup %1245 }
 0xc82   :  { %v1248_v21 = vpop.eup %1247 }
 0xc83   :  { %v919_v43 = vadd.f32 %v1244_v19, %v918_v29  ;;  %v1250_v23 = vpop.eup %1249 }
 0xc84   :  { %v1252_v24 = vpop.eup %1251 }
 0xc85   :  { %v920_v41 = vadd.f32 %v1246_v20, %v919_v43 }
 0xc87   :  { %v921_v22 = vadd.f32 %v1248_v21, %v920_v41 }
 0xc89   :  { %v922_v47 = vadd.f32 %v1250_v23, %v921_v22 }
 0xc8b   :  { %v923_v44 = vadd.f32 %v1252_v24, %v922_v47 }
 0xc8d   :  { %1253 = vrcp.f32 %v923_v44  ;;  %v935_v46 = vand.u32 2147483648, %v923_v44  ;;  %v933_v32 = vand.u32 2147483647, %v923_v44  ;;  %vm929_vm5 = vweird.f32 %v923_v44 }
 0xc8f   :  { %v936_v39 = vor.u32 1.1754944e-38, %v935_v46  ;;  %vm934_vm7 = vcmp.eq.f32.partialorder %v933_v32, 8.507059e+37 }
 0xc93   :  { %v1254_v25 = vpop.eup %1253 }
 0xc94   :  { %v925_v27 = vmul.f32 %v1254_v25, %v923_v44  ;;  %vm930_vm4 = vweird.f32 %v1254_v25 }
 0xc95   :  { %vm931_vm6 = vmor %vm929_vm5, %vm930_vm4 }
 0xc96   :  { %v926_v28 = vsub.f32 1.0, %v925_v27 }
 0xc98   :  { %v927_v30 = vmul.f32 %v1254_v25, %v926_v28 }
 0xc9a   :  { %v928_v34 = vadd.f32 %v1254_v25, %v927_v30 }
 0xc9c   :  { %v932_v37 = vsel %vm931_vm6, %v1254_v25, %v928_v34 }
 0xc9d   :  { %v937_v45 = vsel %vm934_vm7, %v936_v39, %v932_v37 }
 0xc9e   :  { %v941_v49 = vmul.f32 %v1242_v17, %v937_v45  ;;  %v940_v50 = vmul.f32 %v1240_v18, %v937_v45  ;;  %v939_v51 = vmul.f32 %v1238_v7, %v937_v45  ;;  %v943_v52 = vmul.f32 %v1246_v20, %v937_v45 }
 0xc9f   :  { %v945_v53 = vmul.f32 %v1250_v23, %v937_v45  ;;  %v942_v54 = vmul.f32 %v1244_v19, %v937_v45  ;;  %v946_v55 = vmul.f32 %v1252_v24, %v937_v45  ;;  %v944_v56 = vmul.f32 %v1248_v21, %v937_v45 }
 0xca0   :  { %962 = vperm.xlu1 %1188, %v941_v49   ;;  %955 = vperm.xlu0 %1187, %v940_v50  }
 0xca1   :  { %949 = vperm.xlu2 %1186, %v939_v51  }
 0xca8   :  { %976 = vperm.xlu1 %1188, %v943_v52   ;;  %990 = vperm.xlu0 %1187, %v945_v53  }
 0xca9   :  { %969 = vperm.xlu2 %1186, %v942_v54  }
 0xcb0   :  { %997 = vperm.xlu1 %1188, %v946_v55  }
 0xcb1   :  { %983 = vperm.xlu2 %1186, %v944_v56  }
 0xcb9   :  { %1022 = vrot.lane.b32.xlu2 %v1642_v26, %s1282_s1 }
 0xcfb   :  { %v950_v42 = vpop.permute.xlu2 %949 }
 0xcfc   :  { %1028 = vst.msk [vmem:[#allocation2 + $0x58] sm:$0xff] %vm209_vm2, %v950_v42  ;;  %v952_v60 = vmul.f32 %v950_v42, %v1664_v35 }
 0xd03   :  { %v970_v57 = vpop.permute.xlu2 %969 }
 0xd04   :  { %1034 = vst.msk [vmem:[#allocation2 + $0x70] sm:$0xff] %vm209_vm2, %v970_v57  ;;  %v972_v0 = vmul.f32 %v970_v57, %v1648_v8 }
 0xd0b   :  { %v984_v40 = vpop.permute.xlu2 %983 }
 0xd0c   :  { %1038 = vst.msk [vmem:[#allocation2 + $0x80] sm:$0xff] %vm209_vm2, %v984_v40 }
 0xd12   :  { %v963_v58 = vpop.permute.xlu1 %962  ;;  %v956_v59 = vpop.permute.xlu0 %955 }
 0xd13   :  { %1032 = vst.msk [vmem:[#allocation2 + $0x68] sm:$0xff] %vm209_vm2, %v963_v58  ;;  %v958_v61 = vmul.f32 %v956_v59, %v1681_v38  ;;  %v1023_v62 = vpop.permute.xlu2 %1022  ;;  %v965_v26 = vmul.f32 %v963_v58, %v1618_v13  ;;  %v986_v38 = vmul.f32 %v984_v40, %v1622_v14 }
 0xd14   :  { %1030 = vst.msk [vmem:[#allocation2 + $0x60] sm:$0xff] %vm209_vm2, %v956_v59 }
 0xd15   :  { %v959_v6 = vadd.f32 %v958_v61, %v952_v60  ;;  %1026 = vst.msk [vmem:[#allocation2 + $0x50] sm:$0xff] %vm209_vm2, %v1023_v62 }
 0xd17   :  { %v966_v63 = vadd.f32 %v965_v26, %v959_v6 }
 0xd19   :  { %v973_v2 = vadd.f32 %v972_v0, %v966_v63 }
 0xd1a   :  { %v977_v31 = vpop.permute.xlu1 %976  ;;  %v991_v1 = vpop.permute.xlu0 %990 }
 0xd1b   :  { %v979_v35 = vmul.f32 %v977_v31, %v1652_v9  ;;  %1036 = vst.msk [vmem:[#allocation2 + $0x78] sm:$0xff] %vm209_vm2, %v977_v31  ;;  %v993_v13 = vmul.f32 %v991_v1, %v1685_v48 }
 0xd1c   :  { %1040 = vst.msk [vmem:[#allocation2 + $0x88] sm:$0xff] %vm209_vm2, %v991_v1 }
 0xd1d   :  { %v980_v4 = vadd.f32 %v979_v35, %v973_v2 }
 0xd1f   :  { %v987_v5 = vadd.f32 %v986_v38, %v980_v4 }
 0xd21   :  { %v994_v10 = vadd.f32 %v993_v13, %v987_v5 }
 0xd22   :  { %v998_v8 = vpop.permute.xlu1 %997 }
 0xd23   :  { %v1000_v9 = vmul.f32 %v998_v8, %v1668_v36  ;;  %1042 = vst.msk [vmem:[#allocation2 + $0x90] sm:$0xff] %vm209_vm2, %v998_v8 }
 0xd25   :  { %v1001_v11 = vadd.f32 %v1000_v9, %v994_v10 }
 0xd27   :  { %1018 = vst.msk [vmem:[#allocation2 + $0x40] sm:$0xff] %vm209_vm2, %v1001_v11 }
 0xd28   :  { %1055 = dma.vmem_to_hbm [thread:$0]  %s1048_s10, 2432, %s1050_s13, [#allocation3], %s1284_s14, %s1284_s14, %s1285_s15  }
 0xd29   :  { %1279 = dma.done.wait [#allocation3], 2432  }
 0xd2a   :  { %1280 = vsyncadd [#allocation3], 4294964864 }
 0xd2b   :  { %1060 = vsyncpa [#allocation3], 1 }

</bundles_post_ra>
